<compile_context>
chip_gen: v5e
topology: v5e:2x2
jax: 0.10.0
libtpu: 0.0.40
codegen_flags: <defaults>
</compile_context>

<pallas_src>
import jax
import jax.numpy as jnp
from jax import lax
from jax.experimental import pallas as pl
from jax.experimental.pallas import tpu as pltpu

BT = 8  # batch tile = one sublane group


# ---------------------------------------------------------------------------
# Fused kernel: Conv1d(k, same pad) + ReLU  ->  LSTM  ->  Linear(classes)
# One grid step processes one batch tile of BT rows for the full sequence.
# ---------------------------------------------------------------------------
def fused_cnn_lstm_kernel(x_ref, wconv_ref, bconv_ref, wih_ref, blstm_ref,
                          whh_ref, wfc_ref, bfc_ref, out_ref):
    # x_ref    : (1, L*BT, Cin) f32   rows ordered (t, b_in_tile)-major
    # wconv_ref: (K, Cin, Cout) bf16  per-tap conv weights
    # bconv_ref: (1, Cout) f32
    # wih_ref  : (Cout, 4H) bf16      blstm_ref: (1, 4H) f32 (b_ih + b_hh)
    # whh_ref  : (H, 4H) bf16
    # wfc_ref  : (H, classes) f32     bfc_ref : (1, classes) f32
    # out_ref  : (1, BT, classes) f32
    _, LB, Cin = x_ref.shape
    K, _, Cout = wconv_ref.shape
    pad = (K - 1) // 2
    Bt = out_ref.shape[1]
    L = LB // Bt
    H = wfc_ref.shape[0]
    H4 = whh_ref.shape[1]

    # ---- Conv1d('same') + ReLU as a sum of K shifted matmuls (no scratch) ----
    # NOTE: correctness of the row-shift padding relies on rows being strictly
    # (t, b)-major within the tile, so a shift of exactly Bt rows == one
    # timestep and never mixes batch elements.
    x = x_ref[0]                                             # (LB, Cin) f32
    zrows = jnp.zeros((pad * Bt, Cin), jnp.float32)
    xpad = jnp.concatenate([zrows, x, zrows], axis=0)        # (LB + 2*pad*Bt, Cin)
    acc = jnp.zeros((LB, Cout), jnp.float32)
    for k in range(K):                                       # static taps (K=3)
        xs = xpad[k * Bt:k * Bt + LB, :].astype(jnp.bfloat16)
        acc = acc + jnp.dot(xs, wconv_ref[k],
                            preferred_element_type=jnp.float32)
    feat = jnp.maximum(acc + bconv_ref[...], 0.0).astype(jnp.bfloat16)

    # ---- LSTM input projection hoisted out of the recurrence (registers) ----
    xproj = jnp.dot(feat, wih_ref[...],
                    preferred_element_type=jnp.float32) + blstm_ref[...]

    # ---- lane mask: g-gate lanes (2H..3H) tanh, the rest sigmoid -------------
    lane = lax.broadcasted_iota(jnp.int32, (Bt, H4), 1)
    g_mask = (lane >= 2 * H) & (lane < 3 * H)

    whh = whh_ref[...]                                       # (H, 4H) bf16
    h = jnp.zeros((Bt, H), jnp.float32)
    c = jnp.zeros((Bt, H), jnp.float32)
    for t in range(L):                                       # static unroll (L=16)
        gates = xproj[t * Bt:(t + 1) * Bt, :] + jnp.dot(
            h.astype(jnp.bfloat16), whh,
            preferred_element_type=jnp.float32)              # (Bt, 4H)
        # single-tanh activation: sigmoid(x) = 0.5*tanh(0.5*x) + 0.5
        gs = jnp.where(g_mask, gates, 0.5 * gates)
        th = jnp.tanh(gs)
        act = jnp.where(g_mask, th, 0.5 * th + 0.5)
        i_g = act[:, 0 * H:1 * H]
        f_g = act[:, 1 * H:2 * H]
        g_g = act[:, 2 * H:3 * H]
        o_g = act[:, 3 * H:4 * H]
        c = f_g * c + i_g * g_g
        h = o_g * jnp.tanh(c)

    # ---- last hidden -> Linear(classes) --------------------------------------
    logits = jnp.dot(h, wfc_ref[...],
                     preferred_element_type=jnp.float32) + bfc_ref[...]
    out_ref[0] = logits.astype(out_ref.dtype)


# ---------------------------------------------------------------------------
# Full forward: cnn(x) -> permute(0, 2, 1) -> lstm head   (PyTorch semantics)
# ---------------------------------------------------------------------------
def cnn_feed_lstm_forward(x_ncl, params):
    # x_ncl: (B, Cin, L) -- PyTorch NCL convention.
    B, Cin, L = x_ncl.shape
    K, _, Cout = params["conv_w"].shape
    assert K % 2 == 1, "only odd kernel sizes reproduce PyTorch padding=K//2"
    H = params["w_hh"].shape[0]
    classes = params["w_fc"].shape[1]

    n_tiles = pl.cdiv(B, BT)
    Bp = n_tiles * BT

    # NCL -> (L, B, Cin), pad batch to a full sublane tile, regroup to
    # (tile, t, b_in_tile) so each grid step owns one contiguous batch tile.
    x_lbc = jnp.transpose(x_ncl, (2, 0, 1))                       # (L, B, Cin)
    x_lbc = jnp.pad(x_lbc, ((0, 0), (0, Bp - B), (0, 0)))
    x_rows = (x_lbc.reshape(L, n_tiles, BT, Cin)
              .transpose(1, 0, 2, 3)
              .reshape(n_tiles, L * BT, Cin))

    w_conv = params["conv_w"].astype(jnp.bfloat16)                # (K, Cin, Cout)
    b_conv = params["conv_b"].reshape(1, Cout).astype(jnp.float32)
    w_ih = params["w_ih"].astype(jnp.bfloat16)                    # (Cout, 4H)
    # PyTorch nn.LSTM has two bias vectors; they only ever appear summed.
    b_lstm = (params["b_ih"] + params["b_hh"]).reshape(1, 4 * H)
    w_hh = params["w_hh"].astype(jnp.bfloat16)                    # (H, 4H)
    w_fc = params["w_fc"]                                         # (H, classes) f32
    b_fc = params["b_fc"].reshape(1, classes)

    full = lambda shp: pl.BlockSpec(shp, lambda i, _s=shp: (0,) * len(_s))
    out = pl.pallas_call(
        fused_cnn_lstm_kernel,
        out_shape=jax.ShapeDtypeStruct((n_tiles, BT, classes), jnp.float32),
        grid=(n_tiles,),
        in_specs=[
            pl.BlockSpec((1, L * BT, Cin), lambda i: (i, 0, 0)),  # x tile
            full((K, Cin, Cout)),
            full((1, Cout)),
            full((Cout, 4 * H)),
            full((1, 4 * H)),
            full((H, 4 * H)),
            full((H, classes)),
            full((1, classes)),
        ],
        out_specs=pl.BlockSpec((1, BT, classes), lambda i: (i, 0, 0)),
        compiler_params=pltpu.CompilerParams(
            dimension_semantics=("parallel",)),
    )(x_rows, w_conv, b_conv, w_ih, b_lstm, w_hh, w_fc, b_fc)

    return out.reshape(Bp, classes)[:B]


def init_params(key, cin=4, cout=8, ksize=3, hidden=32, classes=4):
    ks = jax.random.split(key, 8)
    s = 0.1
    return {
        "conv_w": s * jax.random.normal(ks[0], (ksize, cin, cout), jnp.float32),
        "conv_b": s * jax.random.normal(ks[1], (cout,), jnp.float32),
        "w_ih":   s * jax.random.normal(ks[2], (cout, 4 * hidden), jnp.float32),
        "w_hh":   s * jax.random.normal(ks[3], (hidden, 4 * hidden), jnp.float32),
        "b_ih":   s * jax.random.normal(ks[4], (4 * hidden,), jnp.float32),
        "b_hh":   s * jax.random.normal(ks[5], (4 * hidden,), jnp.float32),
        "w_fc":   s * jax.random.normal(ks[6], (hidden, classes), jnp.float32),
        "b_fc":   s * jax.random.normal(ks[7], (classes,), jnp.float32),
    }


def _reference(x_ncl, params):
    """Pure-JAX f32 reference of the same representative forward pass."""
    B, Cin, L = x_ncl.shape
    K, _, Cout = params["conv_w"].shape
    pad = (K - 1) // 2
    H = params["w_hh"].shape[0]
    x_blc = jnp.transpose(x_ncl, (0, 2, 1))
    xp = jnp.pad(x_blc, ((0, 0), (pad, pad), (0, 0)))
    feat = jnp.zeros((B, L, Cout), jnp.float32)
    for k in range(K):
        feat = feat + xp[:, k:k + L, :] @ params["conv_w"][k]
    feat = jnp.maximum(feat + params["conv_b"][None, None, :], 0.0)
    b = params["b_ih"] + params["b_hh"]
    h = jnp.zeros((B, H), jnp.float32)
    c = jnp.zeros((B, H), jnp.float32)
    for t in range(L):
        g = feat[:, t, :] @ params["w_ih"] + h @ params["w_hh"] + b[None, :]
        i = jax.nn.sigmoid(g[:, 0 * H:1 * H])
        f = jax.nn.sigmoid(g[:, 1 * H:2 * H])
        gg = jnp.tanh(g[:, 2 * H:3 * H])
        o = jax.nn.sigmoid(g[:, 3 * H:4 * H])
        c = f * c + i * gg
        h = o * jnp.tanh(c)
    return h @ params["w_fc"] + params["b_fc"][None, :]


if __name__ == "__main__":
    key = jax.random.PRNGKey(0)
    kx, kp = jax.random.split(key)

    B, Cin, L = 2, 4, 16
    x = jax.random.normal(kx, (B, Cin, L), jnp.float32)      # NCL, like PyTorch
    params = init_params(kp, cin=Cin, cout=8, ksize=3, hidden=32, classes=4)

    fwd = jax.jit(cnn_feed_lstm_forward)
    out = fwd(x, params)                                     # (B, classes)
    jax.block_until_ready(out)
    assert out.shape == (B, 4)

    ref = _reference(x, params)
    err = float(jnp.max(jnp.abs(out - ref)))
    # bf16 MXU inputs (f32 accumulation) vs. a pure-f32 reference.
    assert err < 2e-2, f"mismatch vs pure-JAX reference: {err}"

    print("KERNEL_OK")
</pallas_src>

<mosaic_0001>
module attributes {stable_mosaic.version = 11 : i64} {
  func.func @fused_cnn_lstm_kernel(%arg0: i32, %arg1: memref<1x128x4xf32, #tpu.memory_space<vmem>>, %arg2: memref<3x4x8xbf16, #tpu.memory_space<vmem>>, %arg3: memref<1x8xf32, #tpu.memory_space<vmem>>, %arg4: memref<8x128xbf16, #tpu.memory_space<vmem>>, %arg5: memref<1x128xf32, #tpu.memory_space<vmem>>, %arg6: memref<32x128xbf16, #tpu.memory_space<vmem>>, %arg7: memref<32x4xf32, #tpu.memory_space<vmem>>, %arg8: memref<1x4xf32, #tpu.memory_space<vmem>>, %arg9: memref<1x8x4xf32, #tpu.memory_space<vmem>>) attributes {dimension_semantics = [#tpu.dimension_semantics<parallel>], iteration_bounds = array<i64: 1>, scalar_prefetch = 0 : i64, scratch_operands = 0 : i64, tpu.core_type = #tpu.core_type<tc>, window_params = [{transform_indices = @transform_0, window_bounds = array<i64: 1, 128, 4>}, {pipeline_mode = #tpu.pipeline_mode<synchronous>, transform_indices = @transform_1, window_bounds = array<i64: 3, 4, 8>}, {pipeline_mode = #tpu.pipeline_mode<synchronous>, transform_indices = @transform_2, window_bounds = array<i64: 1, 8>}, {pipeline_mode = #tpu.pipeline_mode<synchronous>, transform_indices = @transform_3, window_bounds = array<i64: 8, 128>}, {pipeline_mode = #tpu.pipeline_mode<synchronous>, transform_indices = @transform_4, window_bounds = array<i64: 1, 128>}, {pipeline_mode = #tpu.pipeline_mode<synchronous>, transform_indices = @transform_5, window_bounds = array<i64: 32, 128>}, {pipeline_mode = #tpu.pipeline_mode<synchronous>, transform_indices = @transform_6, window_bounds = array<i64: 32, 4>}, {pipeline_mode = #tpu.pipeline_mode<synchronous>, transform_indices = @transform_7, window_bounds = array<i64: 1, 4>}, {transform_indices = @transform_8, window_bounds = array<i64: 1, 8, 4>}]} {
    %c0 = arith.constant 0 : index
    %c0_0 = arith.constant 0 : index
    %c0_1 = arith.constant 0 : index
    %0 = vector.load %arg1[%c0, %c0_0, %c0_1] : memref<1x128x4xf32, #tpu.memory_space<vmem>>, vector<1x128x4xf32>
    %1 = vector.shape_cast %0 : vector<1x128x4xf32> to vector<128x4xf32>
    %cst = arith.constant 0.000000e+00 : f32
    %2 = vector.broadcast %cst : f32 to vector<8x4xf32>
    %3 = tpu.concatenate %2, %1, %2 in 0 : vector<8x4xf32>, vector<128x4xf32>, vector<8x4xf32> -> vector<144x4xf32>
    %cst_2 = arith.constant 0.000000e+00 : f32
    %4 = vector.broadcast %cst_2 : f32 to vector<128x8xf32>
    %5 = vector.extract_strided_slice %3 {offsets = [0, 0], sizes = [128, 4], strides = [1, 1]} : vector<144x4xf32> to vector<128x4xf32>
    %6 = arith.truncf %5 : vector<128x4xf32> to vector<128x4xbf16>
    %c0_3 = arith.constant 0 : index
    %c0_4 = arith.constant 0 : index
    %c0_5 = arith.constant 0 : index
    %7 = vector.load %arg2[%c0_3, %c0_4, %c0_5] : memref<3x4x8xbf16, #tpu.memory_space<vmem>>, vector<1x4x8xbf16>
    %8 = vector.shape_cast %7 : vector<1x4x8xbf16> to vector<4x8xbf16>
    %cst_6 = arith.constant dense<0.000000e+00> : vector<128x8xf32>
    %9 = tpu.matmul %6, %8, %cst_6 {dimension_numbers = #tpu.dot_dimension_numbers<[1], [0], [0], [1], [0, 0, 1, 1], [], []>} : vector<128x4xbf16>, vector<4x8xbf16>, vector<128x8xf32> -> vector<128x8xf32>
    %10 = arith.addf %4, %9 : vector<128x8xf32>
    %11 = vector.extract_strided_slice %3 {offsets = [8, 0], sizes = [128, 4], strides = [1, 1]} : vector<144x4xf32> to vector<128x4xf32>
    %12 = arith.truncf %11 : vector<128x4xf32> to vector<128x4xbf16>
    %c1 = arith.constant 1 : index
    %c0_7 = arith.constant 0 : index
    %c0_8 = arith.constant 0 : index
    %13 = vector.load %arg2[%c1, %c0_7, %c0_8] : memref<3x4x8xbf16, #tpu.memory_space<vmem>>, vector<1x4x8xbf16>
    %14 = vector.shape_cast %13 : vector<1x4x8xbf16> to vector<4x8xbf16>
    %cst_9 = arith.constant dense<0.000000e+00> : vector<128x8xf32>
    %15 = tpu.matmul %12, %14, %cst_9 {dimension_numbers = #tpu.dot_dimension_numbers<[1], [0], [0], [1], [0, 0, 1, 1], [], []>} : vector<128x4xbf16>, vector<4x8xbf16>, vector<128x8xf32> -> vector<128x8xf32>
    %16 = arith.addf %10, %15 : vector<128x8xf32>
    %17 = vector.extract_strided_slice %3 {offsets = [16, 0], sizes = [128, 4], strides = [1, 1]} : vector<144x4xf32> to vector<128x4xf32>
    %18 = arith.truncf %17 : vector<128x4xf32> to vector<128x4xbf16>
    %c2 = arith.constant 2 : index
    %c0_10 = arith.constant 0 : index
    %c0_11 = arith.constant 0 : index
    %19 = vector.load %arg2[%c2, %c0_10, %c0_11] : memref<3x4x8xbf16, #tpu.memory_space<vmem>>, vector<1x4x8xbf16>
    %20 = vector.shape_cast %19 : vector<1x4x8xbf16> to vector<4x8xbf16>
    %cst_12 = arith.constant dense<0.000000e+00> : vector<128x8xf32>
    %21 = tpu.matmul %18, %20, %cst_12 {dimension_numbers = #tpu.dot_dimension_numbers<[1], [0], [0], [1], [0, 0, 1, 1], [], []>} : vector<128x4xbf16>, vector<4x8xbf16>, vector<128x8xf32> -> vector<128x8xf32>
    %22 = arith.addf %16, %21 : vector<128x8xf32>
    %c0_13 = arith.constant 0 : index
    %c0_14 = arith.constant 0 : index
    %23 = vector.load %arg3[%c0_13, %c0_14] : memref<1x8xf32, #tpu.memory_space<vmem>>, vector<1x8xf32>
    %24 = vector.broadcast %23 : vector<1x8xf32> to vector<128x8xf32>
    %25 = arith.addf %22, %24 : vector<128x8xf32>
    %cst_15 = arith.constant 0.000000e+00 : f32
    %26 = vector.broadcast %cst_15 : f32 to vector<128x8xf32>
    %27 = arith.maximumf %25, %26 : vector<128x8xf32>
    %28 = arith.truncf %27 : vector<128x8xf32> to vector<128x8xbf16>
    %c0_16 = arith.constant 0 : index
    %c0_17 = arith.constant 0 : index
    %29 = vector.load %arg4[%c0_16, %c0_17] : memref<8x128xbf16, #tpu.memory_space<vmem>>, vector<8x128xbf16>
    %cst_18 = arith.constant dense<0.000000e+00> : vector<128x128xf32>
    %30 = tpu.matmul %28, %29, %cst_18 {dimension_numbers = #tpu.dot_dimension_numbers<[1], [0], [0], [1], [0, 0, 1, 1], [], []>} : vector<128x8xbf16>, vector<8x128xbf16>, vector<128x128xf32> -> vector<128x128xf32>
    %c0_19 = arith.constant 0 : index
    %c0_20 = arith.constant 0 : index
    %31 = vector.load %arg5[%c0_19, %c0_20] : memref<1x128xf32, #tpu.memory_space<vmem>>, vector<1x128xf32>
    %32 = vector.broadcast %31 : vector<1x128xf32> to vector<128x128xf32>
    %33 = arith.addf %30, %32 : vector<128x128xf32>
    %34 = tpu.iota {dimensions = array<i32: 1>} : vector<8x128xi32>
    %c64_i32 = arith.constant 64 : i32
    %35 = vector.broadcast %c64_i32 : i32 to vector<8x128xi32>
    %36 = arith.cmpi sge, %34, %35 : vector<8x128xi32>
    %c96_i32 = arith.constant 96 : i32
    %37 = vector.broadcast %c96_i32 : i32 to vector<8x128xi32>
    %38 = arith.cmpi slt, %34, %37 : vector<8x128xi32>
    %39 = arith.andi %36, %38 : vector<8x128xi1>
    %c0_21 = arith.constant 0 : index
    %c0_22 = arith.constant 0 : index
    %40 = vector.load %arg6[%c0_21, %c0_22] : memref<32x128xbf16, #tpu.memory_space<vmem>>, vector<32x128xbf16>
    %cst_23 = arith.constant 0.000000e+00 : f32
    %41 = vector.broadcast %cst_23 : f32 to vector<8x32xf32>
    %cst_24 = arith.constant 0.000000e+00 : f32
    %42 = vector.broadcast %cst_24 : f32 to vector<8x32xf32>
    %43 = vector.extract_strided_slice %33 {offsets = [0, 0], sizes = [8, 128], strides = [1, 1]} : vector<128x128xf32> to vector<8x128xf32>
    %44 = arith.truncf %41 : vector<8x32xf32> to vector<8x32xbf16>
    %cst_25 = arith.constant dense<0.000000e+00> : vector<8x128xf32>
    %45 = tpu.matmul %44, %40, %cst_25 {dimension_numbers = #tpu.dot_dimension_numbers<[1], [0], [0], [1], [0, 0, 1, 1], [], []>} : vector<8x32xbf16>, vector<32x128xbf16>, vector<8x128xf32> -> vector<8x128xf32>
    %46 = arith.addf %43, %45 : vector<8x128xf32>
    %cst_26 = arith.constant 5.000000e-01 : f32
    %47 = vector.broadcast %cst_26 : f32 to vector<8x128xf32>
    %48 = arith.mulf %47, %46 : vector<8x128xf32>
    %49 = arith.select %39, %46, %48 : vector<8x128xi1>, vector<8x128xf32>
    %50 = math.tanh %49 : vector<8x128xf32>
    %cst_27 = arith.constant 5.000000e-01 : f32
    %51 = vector.broadcast %cst_27 : f32 to vector<8x128xf32>
    %52 = arith.mulf %51, %50 : vector<8x128xf32>
    %cst_28 = arith.constant 5.000000e-01 : f32
    %53 = vector.broadcast %cst_28 : f32 to vector<8x128xf32>
    %54 = arith.addf %52, %53 : vector<8x128xf32>
    %55 = arith.select %39, %50, %54 : vector<8x128xi1>, vector<8x128xf32>
    %56 = vector.extract_strided_slice %55 {offsets = [0, 0], sizes = [8, 32], strides = [1, 1]} : vector<8x128xf32> to vector<8x32xf32>
    %57 = vector.extract_strided_slice %55 {offsets = [0, 32], sizes = [8, 32], strides = [1, 1]} : vector<8x128xf32> to vector<8x32xf32>
    %58 = vector.extract_strided_slice %55 {offsets = [0, 64], sizes = [8, 32], strides = [1, 1]} : vector<8x128xf32> to vector<8x32xf32>
    %59 = vector.extract_strided_slice %55 {offsets = [0, 96], sizes = [8, 32], strides = [1, 1]} : vector<8x128xf32> to vector<8x32xf32>
    %60 = arith.mulf %57, %42 : vector<8x32xf32>
    %61 = arith.mulf %56, %58 : vector<8x32xf32>
    %62 = arith.addf %60, %61 : vector<8x32xf32>
    %63 = math.tanh %62 : vector<8x32xf32>
    %64 = arith.mulf %59, %63 : vector<8x32xf32>
    %65 = vector.extract_strided_slice %33 {offsets = [8, 0], sizes = [8, 128], strides = [1, 1]} : vector<128x128xf32> to vector<8x128xf32>
    %66 = arith.truncf %64 : vector<8x32xf32> to vector<8x32xbf16>
    %cst_29 = arith.constant dense<0.000000e+00> : vector<8x128xf32>
    %67 = tpu.matmul %66, %40, %cst_29 {dimension_numbers = #tpu.dot_dimension_numbers<[1], [0], [0], [1], [0, 0, 1, 1], [], []>} : vector<8x32xbf16>, vector<32x128xbf16>, vector<8x128xf32> -> vector<8x128xf32>
    %68 = arith.addf %65, %67 : vector<8x128xf32>
    %cst_30 = arith.constant 5.000000e-01 : f32
    %69 = vector.broadcast %cst_30 : f32 to vector<8x128xf32>
    %70 = arith.mulf %69, %68 : vector<8x128xf32>
    %71 = arith.select %39, %68, %70 : vector<8x128xi1>, vector<8x128xf32>
    %72 = math.tanh %71 : vector<8x128xf32>
    %cst_31 = arith.constant 5.000000e-01 : f32
    %73 = vector.broadcast %cst_31 : f32 to vector<8x128xf32>
    %74 = arith.mulf %73, %72 : vector<8x128xf32>
    %cst_32 = arith.constant 5.000000e-01 : f32
    %75 = vector.broadcast %cst_32 : f32 to vector<8x128xf32>
    %76 = arith.addf %74, %75 : vector<8x128xf32>
    %77 = arith.select %39, %72, %76 : vector<8x128xi1>, vector<8x128xf32>
    %78 = vector.extract_strided_slice %77 {offsets = [0, 0], sizes = [8, 32], strides = [1, 1]} : vector<8x128xf32> to vector<8x32xf32>
    %79 = vector.extract_strided_slice %77 {offsets = [0, 32], sizes = [8, 32], strides = [1, 1]} : vector<8x128xf32> to vector<8x32xf32>
    %80 = vector.extract_strided_slice %77 {offsets = [0, 64], sizes = [8, 32], strides = [1, 1]} : vector<8x128xf32> to vector<8x32xf32>
    %81 = vector.extract_strided_slice %77 {offsets = [0, 96], sizes = [8, 32], strides = [1, 1]} : vector<8x128xf32> to vector<8x32xf32>
    %82 = arith.mulf %79, %62 : vector<8x32xf32>
    %83 = arith.mulf %78, %80 : vector<8x32xf32>
    %84 = arith.addf %82, %83 : vector<8x32xf32>
    %85 = math.tanh %84 : vector<8x32xf32>
    %86 = arith.mulf %81, %85 : vector<8x32xf32>
    %87 = vector.extract_strided_slice %33 {offsets = [16, 0], sizes = [8, 128], strides = [1, 1]} : vector<128x128xf32> to vector<8x128xf32>
    %88 = arith.truncf %86 : vector<8x32xf32> to vector<8x32xbf16>
    %cst_33 = arith.constant dense<0.000000e+00> : vector<8x128xf32>
    %89 = tpu.matmul %88, %40, %cst_33 {dimension_numbers = #tpu.dot_dimension_numbers<[1], [0], [0], [1], [0, 0, 1, 1], [], []>} : vector<8x32xbf16>, vector<32x128xbf16>, vector<8x128xf32> -> vector<8x128xf32>
    %90 = arith.addf %87, %89 : vector<8x128xf32>
    %cst_34 = arith.constant 5.000000e-01 : f32
    %91 = vector.broadcast %cst_34 : f32 to vector<8x128xf32>
    %92 = arith.mulf %91, %90 : vector<8x128xf32>
    %93 = arith.select %39, %90, %92 : vector<8x128xi1>, vector<8x128xf32>
    %94 = math.tanh %93 : vector<8x128xf32>
    %cst_35 = arith.constant 5.000000e-01 : f32
    %95 = vector.broadcast %cst_35 : f32 to vector<8x128xf32>
    %96 = arith.mulf %95, %94 : vector<8x128xf32>
    %cst_36 = arith.constant 5.000000e-01 : f32
    %97 = vector.broadcast %cst_36 : f32 to vector<8x128xf32>
    %98 = arith.addf %96, %97 : vector<8x128xf32>
    %99 = arith.select %39, %94, %98 : vector<8x128xi1>, vector<8x128xf32>
    %100 = vector.extract_strided_slice %99 {offsets = [0, 0], sizes = [8, 32], strides = [1, 1]} : vector<8x128xf32> to vector<8x32xf32>
    %101 = vector.extract_strided_slice %99 {offsets = [0, 32], sizes = [8, 32], strides = [1, 1]} : vector<8x128xf32> to vector<8x32xf32>
    %102 = vector.extract_strided_slice %99 {offsets = [0, 64], sizes = [8, 32], strides = [1, 1]} : vector<8x128xf32> to vector<8x32xf32>
    %103 = vector.extract_strided_slice %99 {offsets = [0, 96], sizes = [8, 32], strides = [1, 1]} : vector<8x128xf32> to vector<8x32xf32>
    %104 = arith.mulf %101, %84 : vector<8x32xf32>
    %105 = arith.mulf %100, %102 : vector<8x32xf32>
    %106 = arith.addf %104, %105 : vector<8x32xf32>
    %107 = math.tanh %106 : vector<8x32xf32>
    %108 = arith.mulf %103, %107 : vector<8x32xf32>
    %109 = vector.extract_strided_slice %33 {offsets = [24, 0], sizes = [8, 128], strides = [1, 1]} : vector<128x128xf32> to vector<8x128xf32>
    %110 = arith.truncf %108 : vector<8x32xf32> to vector<8x32xbf16>
    %cst_37 = arith.constant dense<0.000000e+00> : vector<8x128xf32>
    %111 = tpu.matmul %110, %40, %cst_37 {dimension_numbers = #tpu.dot_dimension_numbers<[1], [0], [0], [1], [0, 0, 1, 1], [], []>} : vector<8x32xbf16>, vector<32x128xbf16>, vector<8x128xf32> -> vector<8x128xf32>
    %112 = arith.addf %109, %111 : vector<8x128xf32>
    %cst_38 = arith.constant 5.000000e-01 : f32
    %113 = vector.broadcast %cst_38 : f32 to vector<8x128xf32>
    %114 = arith.mulf %113, %112 : vector<8x128xf32>
    %115 = arith.select %39, %112, %114 : vector<8x128xi1>, vector<8x128xf32>
    %116 = math.tanh %115 : vector<8x128xf32>
    %cst_39 = arith.constant 5.000000e-01 : f32
    %117 = vector.broadcast %cst_39 : f32 to vector<8x128xf32>
    %118 = arith.mulf %117, %116 : vector<8x128xf32>
    %cst_40 = arith.constant 5.000000e-01 : f32
    %119 = vector.broadcast %cst_40 : f32 to vector<8x128xf32>
    %120 = arith.addf %118, %119 : vector<8x128xf32>
    %121 = arith.select %39, %116, %120 : vector<8x128xi1>, vector<8x128xf32>
    %122 = vector.extract_strided_slice %121 {offsets = [0, 0], sizes = [8, 32], strides = [1, 1]} : vector<8x128xf32> to vector<8x32xf32>
    %123 = vector.extract_strided_slice %121 {offsets = [0, 32], sizes = [8, 32], strides = [1, 1]} : vector<8x128xf32> to vector<8x32xf32>
    %124 = vector.extract_strided_slice %121 {offsets = [0, 64], sizes = [8, 32], strides = [1, 1]} : vector<8x128xf32> to vector<8x32xf32>
    %125 = vector.extract_strided_slice %121 {offsets = [0, 96], sizes = [8, 32], strides = [1, 1]} : vector<8x128xf32> to vector<8x32xf32>
    %126 = arith.mulf %123, %106 : vector<8x32xf32>
    %127 = arith.mulf %122, %124 : vector<8x32xf32>
    %128 = arith.addf %126, %127 : vector<8x32xf32>
    %129 = math.tanh %128 : vector<8x32xf32>
    %130 = arith.mulf %125, %129 : vector<8x32xf32>
    %131 = vector.extract_strided_slice %33 {offsets = [32, 0], sizes = [8, 128], strides = [1, 1]} : vector<128x128xf32> to vector<8x128xf32>
    %132 = arith.truncf %130 : vector<8x32xf32> to vector<8x32xbf16>
    %cst_41 = arith.constant dense<0.000000e+00> : vector<8x128xf32>
    %133 = tpu.matmul %132, %40, %cst_41 {dimension_numbers = #tpu.dot_dimension_numbers<[1], [0], [0], [1], [0, 0, 1, 1], [], []>} : vector<8x32xbf16>, vector<32x128xbf16>, vector<8x128xf32> -> vector<8x128xf32>
    %134 = arith.addf %131, %133 : vector<8x128xf32>
    %cst_42 = arith.constant 5.000000e-01 : f32
    %135 = vector.broadcast %cst_42 : f32 to vector<8x128xf32>
    %136 = arith.mulf %135, %134 : vector<8x128xf32>
    %137 = arith.select %39, %134, %136 : vector<8x128xi1>, vector<8x128xf32>
    %138 = math.tanh %137 : vector<8x128xf32>
    %cst_43 = arith.constant 5.000000e-01 : f32
    %139 = vector.broadcast %cst_43 : f32 to vector<8x128xf32>
    %140 = arith.mulf %139, %138 : vector<8x128xf32>
    %cst_44 = arith.constant 5.000000e-01 : f32
    %141 = vector.broadcast %cst_44 : f32 to vector<8x128xf32>
    %142 = arith.addf %140, %141 : vector<8x128xf32>
    %143 = arith.select %39, %138, %142 : vector<8x128xi1>, vector<8x128xf32>
    %144 = vector.extract_strided_slice %143 {offsets = [0, 0], sizes = [8, 32], strides = [1, 1]} : vector<8x128xf32> to vector<8x32xf32>
    %145 = vector.extract_strided_slice %143 {offsets = [0, 32], sizes = [8, 32], strides = [1, 1]} : vector<8x128xf32> to vector<8x32xf32>
    %146 = vector.extract_strided_slice %143 {offsets = [0, 64], sizes = [8, 32], strides = [1, 1]} : vector<8x128xf32> to vector<8x32xf32>
    %147 = vector.extract_strided_slice %143 {offsets = [0, 96], sizes = [8, 32], strides = [1, 1]} : vector<8x128xf32> to vector<8x32xf32>
    %148 = arith.mulf %145, %128 : vector<8x32xf32>
    %149 = arith.mulf %144, %146 : vector<8x32xf32>
    %150 = arith.addf %148, %149 : vector<8x32xf32>
    %151 = math.tanh %150 : vector<8x32xf32>
    %152 = arith.mulf %147, %151 : vector<8x32xf32>
    %153 = vector.extract_strided_slice %33 {offsets = [40, 0], sizes = [8, 128], strides = [1, 1]} : vector<128x128xf32> to vector<8x128xf32>
    %154 = arith.truncf %152 : vector<8x32xf32> to vector<8x32xbf16>
    %cst_45 = arith.constant dense<0.000000e+00> : vector<8x128xf32>
    %155 = tpu.matmul %154, %40, %cst_45 {dimension_numbers = #tpu.dot_dimension_numbers<[1], [0], [0], [1], [0, 0, 1, 1], [], []>} : vector<8x32xbf16>, vector<32x128xbf16>, vector<8x128xf32> -> vector<8x128xf32>
    %156 = arith.addf %153, %155 : vector<8x128xf32>
    %cst_46 = arith.constant 5.000000e-01 : f32
    %157 = vector.broadcast %cst_46 : f32 to vector<8x128xf32>
    %158 = arith.mulf %157, %156 : vector<8x128xf32>
    %159 = arith.select %39, %156, %158 : vector<8x128xi1>, vector<8x128xf32>
    %160 = math.tanh %159 : vector<8x128xf32>
    %cst_47 = arith.constant 5.000000e-01 : f32
    %161 = vector.broadcast %cst_47 : f32 to vector<8x128xf32>
    %162 = arith.mulf %161, %160 : vector<8x128xf32>
    %cst_48 = arith.constant 5.000000e-01 : f32
    %163 = vector.broadcast %cst_48 : f32 to vector<8x128xf32>
    %164 = arith.addf %162, %163 : vector<8x128xf32>
    %165 = arith.select %39, %160, %164 : vector<8x128xi1>, vector<8x128xf32>
    %166 = vector.extract_strided_slice %165 {offsets = [0, 0], sizes = [8, 32], strides = [1, 1]} : vector<8x128xf32> to vector<8x32xf32>
    %167 = vector.extract_strided_slice %165 {offsets = [0, 32], sizes = [8, 32], strides = [1, 1]} : vector<8x128xf32> to vector<8x32xf32>
    %168 = vector.extract_strided_slice %165 {offsets = [0, 64], sizes = [8, 32], strides = [1, 1]} : vector<8x128xf32> to vector<8x32xf32>
    %169 = vector.extract_strided_slice %165 {offsets = [0, 96], sizes = [8, 32], strides = [1, 1]} : vector<8x128xf32> to vector<8x32xf32>
    %170 = arith.mulf %167, %150 : vector<8x32xf32>
    %171 = arith.mulf %166, %168 : vector<8x32xf32>
    %172 = arith.addf %170, %171 : vector<8x32xf32>
    %173 = math.tanh %172 : vector<8x32xf32>
    %174 = arith.mulf %169, %173 : vector<8x32xf32>
    %175 = vector.extract_strided_slice %33 {offsets = [48, 0], sizes = [8, 128], strides = [1, 1]} : vector<128x128xf32> to vector<8x128xf32>
    %176 = arith.truncf %174 : vector<8x32xf32> to vector<8x32xbf16>
    %cst_49 = arith.constant dense<0.000000e+00> : vector<8x128xf32>
    %177 = tpu.matmul %176, %40, %cst_49 {dimension_numbers = #tpu.dot_dimension_numbers<[1], [0], [0], [1], [0, 0, 1, 1], [], []>} : vector<8x32xbf16>, vector<32x128xbf16>, vector<8x128xf32> -> vector<8x128xf32>
    %178 = arith.addf %175, %177 : vector<8x128xf32>
    %cst_50 = arith.constant 5.000000e-01 : f32
    %179 = vector.broadcast %cst_50 : f32 to vector<8x128xf32>
    %180 = arith.mulf %179, %178 : vector<8x128xf32>
    %181 = arith.select %39, %178, %180 : vector<8x128xi1>, vector<8x128xf32>
    %182 = math.tanh %181 : vector<8x128xf32>
    %cst_51 = arith.constant 5.000000e-01 : f32
    %183 = vector.broadcast %cst_51 : f32 to vector<8x128xf32>
    %184 = arith.mulf %183, %182 : vector<8x128xf32>
    %cst_52 = arith.constant 5.000000e-01 : f32
    %185 = vector.broadcast %cst_52 : f32 to vector<8x128xf32>
    %186 = arith.addf %184, %185 : vector<8x128xf32>
    %187 = arith.select %39, %182, %186 : vector<8x128xi1>, vector<8x128xf32>
    %188 = vector.extract_strided_slice %187 {offsets = [0, 0], sizes = [8, 32], strides = [1, 1]} : vector<8x128xf32> to vector<8x32xf32>
    %189 = vector.extract_strided_slice %187 {offsets = [0, 32], sizes = [8, 32], strides = [1, 1]} : vector<8x128xf32> to vector<8x32xf32>
    %190 = vector.extract_strided_slice %187 {offsets = [0, 64], sizes = [8, 32], strides = [1, 1]} : vector<8x128xf32> to vector<8x32xf32>
    %191 = vector.extract_strided_slice %187 {offsets = [0, 96], sizes = [8, 32], strides = [1, 1]} : vector<8x128xf32> to vector<8x32xf32>
    %192 = arith.mulf %189, %172 : vector<8x32xf32>
    %193 = arith.mulf %188, %190 : vector<8x32xf32>
    %194 = arith.addf %192, %193 : vector<8x32xf32>
    %195 = math.tanh %194 : vector<8x32xf32>
    %196 = arith.mulf %191, %195 : vector<8x32xf32>
    %197 = vector.extract_strided_slice %33 {offsets = [56, 0], sizes = [8, 128], strides = [1, 1]} : vector<128x128xf32> to vector<8x128xf32>
    %198 = arith.truncf %196 : vector<8x32xf32> to vector<8x32xbf16>
    %cst_53 = arith.constant dense<0.000000e+00> : vector<8x128xf32>
    %199 = tpu.matmul %198, %40, %cst_53 {dimension_numbers = #tpu.dot_dimension_numbers<[1], [0], [0], [1], [0, 0, 1, 1], [], []>} : vector<8x32xbf16>, vector<32x128xbf16>, vector<8x128xf32> -> vector<8x128xf32>
    %200 = arith.addf %197, %199 : vector<8x128xf32>
    %cst_54 = arith.constant 5.000000e-01 : f32
    %201 = vector.broadcast %cst_54 : f32 to vector<8x128xf32>
    %202 = arith.mulf %201, %200 : vector<8x128xf32>
    %203 = arith.select %39, %200, %202 : vector<8x128xi1>, vector<8x128xf32>
    %204 = math.tanh %203 : vector<8x128xf32>
    %cst_55 = arith.constant 5.000000e-01 : f32
    %205 = vector.broadcast %cst_55 : f32 to vector<8x128xf32>
    %206 = arith.mulf %205, %204 : vector<8x128xf32>
    %cst_56 = arith.constant 5.000000e-01 : f32
    %207 = vector.broadcast %cst_56 : f32 to vector<8x128xf32>
    %208 = arith.addf %206, %207 : vector<8x128xf32>
    %209 = arith.select %39, %204, %208 : vector<8x128xi1>, vector<8x128xf32>
    %210 = vector.extract_strided_slice %209 {offsets = [0, 0], sizes = [8, 32], strides = [1, 1]} : vector<8x128xf32> to vector<8x32xf32>
    %211 = vector.extract_strided_slice %209 {offsets = [0, 32], sizes = [8, 32], strides = [1, 1]} : vector<8x128xf32> to vector<8x32xf32>
    %212 = vector.extract_strided_slice %209 {offsets = [0, 64], sizes = [8, 32], strides = [1, 1]} : vector<8x128xf32> to vector<8x32xf32>
    %213 = vector.extract_strided_slice %209 {offsets = [0, 96], sizes = [8, 32], strides = [1, 1]} : vector<8x128xf32> to vector<8x32xf32>
    %214 = arith.mulf %211, %194 : vector<8x32xf32>
    %215 = arith.mulf %210, %212 : vector<8x32xf32>
    %216 = arith.addf %214, %215 : vector<8x32xf32>
    %217 = math.tanh %216 : vector<8x32xf32>
    %218 = arith.mulf %213, %217 : vector<8x32xf32>
    %219 = vector.extract_strided_slice %33 {offsets = [64, 0], sizes = [8, 128], strides = [1, 1]} : vector<128x128xf32> to vector<8x128xf32>
    %220 = arith.truncf %218 : vector<8x32xf32> to vector<8x32xbf16>
    %cst_57 = arith.constant dense<0.000000e+00> : vector<8x128xf32>
    %221 = tpu.matmul %220, %40, %cst_57 {dimension_numbers = #tpu.dot_dimension_numbers<[1], [0], [0], [1], [0, 0, 1, 1], [], []>} : vector<8x32xbf16>, vector<32x128xbf16>, vector<8x128xf32> -> vector<8x128xf32>
    %222 = arith.addf %219, %221 : vector<8x128xf32>
    %cst_58 = arith.constant 5.000000e-01 : f32
    %223 = vector.broadcast %cst_58 : f32 to vector<8x128xf32>
    %224 = arith.mulf %223, %222 : vector<8x128xf32>
    %225 = arith.select %39, %222, %224 : vector<8x128xi1>, vector<8x128xf32>
    %226 = math.tanh %225 : vector<8x128xf32>
    %cst_59 = arith.constant 5.000000e-01 : f32
    %227 = vector.broadcast %cst_59 : f32 to vector<8x128xf32>
    %228 = arith.mulf %227, %226 : vector<8x128xf32>
    %cst_60 = arith.constant 5.000000e-01 : f32
    %229 = vector.broadcast %cst_60 : f32 to vector<8x128xf32>
    %230 = arith.addf %228, %229 : vector<8x128xf32>
    %231 = arith.select %39, %226, %230 : vector<8x128xi1>, vector<8x128xf32>
    %232 = vector.extract_strided_slice %231 {offsets = [0, 0], sizes = [8, 32], strides = [1, 1]} : vector<8x128xf32> to vector<8x32xf32>
    %233 = vector.extract_strided_slice %231 {offsets = [0, 32], sizes = [8, 32], strides = [1, 1]} : vector<8x128xf32> to vector<8x32xf32>
    %234 = vector.extract_strided_slice %231 {offsets = [0, 64], sizes = [8, 32], strides = [1, 1]} : vector<8x128xf32> to vector<8x32xf32>
    %235 = vector.extract_strided_slice %231 {offsets = [0, 96], sizes = [8, 32], strides = [1, 1]} : vector<8x128xf32> to vector<8x32xf32>
    %236 = arith.mulf %233, %216 : vector<8x32xf32>
    %237 = arith.mulf %232, %234 : vector<8x32xf32>
    %238 = arith.addf %236, %237 : vector<8x32xf32>
    %239 = math.tanh %238 : vector<8x32xf32>
    %240 = arith.mulf %235, %239 : vector<8x32xf32>
    %241 = vector.extract_strided_slice %33 {offsets = [72, 0], sizes = [8, 128], strides = [1, 1]} : vector<128x128xf32> to vector<8x128xf32>
    %242 = arith.truncf %240 : vector<8x32xf32> to vector<8x32xbf16>
    %cst_61 = arith.constant dense<0.000000e+00> : vector<8x128xf32>
    %243 = tpu.matmul %242, %40, %cst_61 {dimension_numbers = #tpu.dot_dimension_numbers<[1], [0], [0], [1], [0, 0, 1, 1], [], []>} : vector<8x32xbf16>, vector<32x128xbf16>, vector<8x128xf32> -> vector<8x128xf32>
    %244 = arith.addf %241, %243 : vector<8x128xf32>
    %cst_62 = arith.constant 5.000000e-01 : f32
    %245 = vector.broadcast %cst_62 : f32 to vector<8x128xf32>
    %246 = arith.mulf %245, %244 : vector<8x128xf32>
    %247 = arith.select %39, %244, %246 : vector<8x128xi1>, vector<8x128xf32>
    %248 = math.tanh %247 : vector<8x128xf32>
    %cst_63 = arith.constant 5.000000e-01 : f32
    %249 = vector.broadcast %cst_63 : f32 to vector<8x128xf32>
    %250 = arith.mulf %249, %248 : vector<8x128xf32>
    %cst_64 = arith.constant 5.000000e-01 : f32
    %251 = vector.broadcast %cst_64 : f32 to vector<8x128xf32>
    %252 = arith.addf %250, %251 : vector<8x128xf32>
    %253 = arith.select %39, %248, %252 : vector<8x128xi1>, vector<8x128xf32>
    %254 = vector.extract_strided_slice %253 {offsets = [0, 0], sizes = [8, 32], strides = [1, 1]} : vector<8x128xf32> to vector<8x32xf32>
    %255 = vector.extract_strided_slice %253 {offsets = [0, 32], sizes = [8, 32], strides = [1, 1]} : vector<8x128xf32> to vector<8x32xf32>
    %256 = vector.extract_strided_slice %253 {offsets = [0, 64], sizes = [8, 32], strides = [1, 1]} : vector<8x128xf32> to vector<8x32xf32>
    %257 = vector.extract_strided_slice %253 {offsets = [0, 96], sizes = [8, 32], strides = [1, 1]} : vector<8x128xf32> to vector<8x32xf32>
    %258 = arith.mulf %255, %238 : vector<8x32xf32>
    %259 = arith.mulf %254, %256 : vector<8x32xf32>
    %260 = arith.addf %258, %259 : vector<8x32xf32>
    %261 = math.tanh %260 : vector<8x32xf32>
    %262 = arith.mulf %257, %261 : vector<8x32xf32>
    %263 = vector.extract_strided_slice %33 {offsets = [80, 0], sizes = [8, 128], strides = [1, 1]} : vector<128x128xf32> to vector<8x128xf32>
    %264 = arith.truncf %262 : vector<8x32xf32> to vector<8x32xbf16>
    %cst_65 = arith.constant dense<0.000000e+00> : vector<8x128xf32>
    %265 = tpu.matmul %264, %40, %cst_65 {dimension_numbers = #tpu.dot_dimension_numbers<[1], [0], [0], [1], [0, 0, 1, 1], [], []>} : vector<8x32xbf16>, vector<32x128xbf16>, vector<8x128xf32> -> vector<8x128xf32>
    %266 = arith.addf %263, %265 : vector<8x128xf32>
    %cst_66 = arith.constant 5.000000e-01 : f32
    %267 = vector.broadcast %cst_66 : f32 to vector<8x128xf32>
    %268 = arith.mulf %267, %266 : vector<8x128xf32>
    %269 = arith.select %39, %266, %268 : vector<8x128xi1>, vector<8x128xf32>
    %270 = math.tanh %269 : vector<8x128xf32>
    %cst_67 = arith.constant 5.000000e-01 : f32
    %271 = vector.broadcast %cst_67 : f32 to vector<8x128xf32>
    %272 = arith.mulf %271, %270 : vector<8x128xf32>
    %cst_68 = arith.constant 5.000000e-01 : f32
    %273 = vector.broadcast %cst_68 : f32 to vector<8x128xf32>
    %274 = arith.addf %272, %273 : vector<8x128xf32>
    %275 = arith.select %39, %270, %274 : vector<8x128xi1>, vector<8x128xf32>
    %276 = vector.extract_strided_slice %275 {offsets = [0, 0], sizes = [8, 32], strides = [1, 1]} : vector<8x128xf32> to vector<8x32xf32>
    %277 = vector.extract_strided_slice %275 {offsets = [0, 32], sizes = [8, 32], strides = [1, 1]} : vector<8x128xf32> to vector<8x32xf32>
    %278 = vector.extract_strided_slice %275 {offsets = [0, 64], sizes = [8, 32], strides = [1, 1]} : vector<8x128xf32> to vector<8x32xf32>
    %279 = vector.extract_strided_slice %275 {offsets = [0, 96], sizes = [8, 32], strides = [1, 1]} : vector<8x128xf32> to vector<8x32xf32>
    %280 = arith.mulf %277, %260 : vector<8x32xf32>
    %281 = arith.mulf %276, %278 : vector<8x32xf32>
    %282 = arith.addf %280, %281 : vector<8x32xf32>
    %283 = math.tanh %282 : vector<8x32xf32>
    %284 = arith.mulf %279, %283 : vector<8x32xf32>
    %285 = vector.extract_strided_slice %33 {offsets = [88, 0], sizes = [8, 128], strides = [1, 1]} : vector<128x128xf32> to vector<8x128xf32>
    %286 = arith.truncf %284 : vector<8x32xf32> to vector<8x32xbf16>
    %cst_69 = arith.constant dense<0.000000e+00> : vector<8x128xf32>
    %287 = tpu.matmul %286, %40, %cst_69 {dimension_numbers = #tpu.dot_dimension_numbers<[1], [0], [0], [1], [0, 0, 1, 1], [], []>} : vector<8x32xbf16>, vector<32x128xbf16>, vector<8x128xf32> -> vector<8x128xf32>
    %288 = arith.addf %285, %287 : vector<8x128xf32>
    %cst_70 = arith.constant 5.000000e-01 : f32
    %289 = vector.broadcast %cst_70 : f32 to vector<8x128xf32>
    %290 = arith.mulf %289, %288 : vector<8x128xf32>
    %291 = arith.select %39, %288, %290 : vector<8x128xi1>, vector<8x128xf32>
    %292 = math.tanh %291 : vector<8x128xf32>
    %cst_71 = arith.constant 5.000000e-01 : f32
    %293 = vector.broadcast %cst_71 : f32 to vector<8x128xf32>
    %294 = arith.mulf %293, %292 : vector<8x128xf32>
    %cst_72 = arith.constant 5.000000e-01 : f32
    %295 = vector.broadcast %cst_72 : f32 to vector<8x128xf32>
    %296 = arith.addf %294, %295 : vector<8x128xf32>
    %297 = arith.select %39, %292, %296 : vector<8x128xi1>, vector<8x128xf32>
    %298 = vector.extract_strided_slice %297 {offsets = [0, 0], sizes = [8, 32], strides = [1, 1]} : vector<8x128xf32> to vector<8x32xf32>
    %299 = vector.extract_strided_slice %297 {offsets = [0, 32], sizes = [8, 32], strides = [1, 1]} : vector<8x128xf32> to vector<8x32xf32>
    %300 = vector.extract_strided_slice %297 {offsets = [0, 64], sizes = [8, 32], strides = [1, 1]} : vector<8x128xf32> to vector<8x32xf32>
    %301 = vector.extract_strided_slice %297 {offsets = [0, 96], sizes = [8, 32], strides = [1, 1]} : vector<8x128xf32> to vector<8x32xf32>
    %302 = arith.mulf %299, %282 : vector<8x32xf32>
    %303 = arith.mulf %298, %300 : vector<8x32xf32>
    %304 = arith.addf %302, %303 : vector<8x32xf32>
    %305 = math.tanh %304 : vector<8x32xf32>
    %306 = arith.mulf %301, %305 : vector<8x32xf32>
    %307 = vector.extract_strided_slice %33 {offsets = [96, 0], sizes = [8, 128], strides = [1, 1]} : vector<128x128xf32> to vector<8x128xf32>
    %308 = arith.truncf %306 : vector<8x32xf32> to vector<8x32xbf16>
    %cst_73 = arith.constant dense<0.000000e+00> : vector<8x128xf32>
    %309 = tpu.matmul %308, %40, %cst_73 {dimension_numbers = #tpu.dot_dimension_numbers<[1], [0], [0], [1], [0, 0, 1, 1], [], []>} : vector<8x32xbf16>, vector<32x128xbf16>, vector<8x128xf32> -> vector<8x128xf32>
    %310 = arith.addf %307, %309 : vector<8x128xf32>
    %cst_74 = arith.constant 5.000000e-01 : f32
    %311 = vector.broadcast %cst_74 : f32 to vector<8x128xf32>
    %312 = arith.mulf %311, %310 : vector<8x128xf32>
    %313 = arith.select %39, %310, %312 : vector<8x128xi1>, vector<8x128xf32>
    %314 = math.tanh %313 : vector<8x128xf32>
    %cst_75 = arith.constant 5.000000e-01 : f32
    %315 = vector.broadcast %cst_75 : f32 to vector<8x128xf32>
    %316 = arith.mulf %315, %314 : vector<8x128xf32>
    %cst_76 = arith.constant 5.000000e-01 : f32
    %317 = vector.broadcast %cst_76 : f32 to vector<8x128xf32>
    %318 = arith.addf %316, %317 : vector<8x128xf32>
    %319 = arith.select %39, %314, %318 : vector<8x128xi1>, vector<8x128xf32>
    %320 = vector.extract_strided_slice %319 {offsets = [0, 0], sizes = [8, 32], strides = [1, 1]} : vector<8x128xf32> to vector<8x32xf32>
    %321 = vector.extract_strided_slice %319 {offsets = [0, 32], sizes = [8, 32], strides = [1, 1]} : vector<8x128xf32> to vector<8x32xf32>
    %322 = vector.extract_strided_slice %319 {offsets = [0, 64], sizes = [8, 32], strides = [1, 1]} : vector<8x128xf32> to vector<8x32xf32>
    %323 = vector.extract_strided_slice %319 {offsets = [0, 96], sizes = [8, 32], strides = [1, 1]} : vector<8x128xf32> to vector<8x32xf32>
    %324 = arith.mulf %321, %304 : vector<8x32xf32>
    %325 = arith.mulf %320, %322 : vector<8x32xf32>
    %326 = arith.addf %324, %325 : vector<8x32xf32>
    %327 = math.tanh %326 : vector<8x32xf32>
    %328 = arith.mulf %323, %327 : vector<8x32xf32>
    %329 = vector.extract_strided_slice %33 {offsets = [104, 0], sizes = [8, 128], strides = [1, 1]} : vector<128x128xf32> to vector<8x128xf32>
    %330 = arith.truncf %328 : vector<8x32xf32> to vector<8x32xbf16>
    %cst_77 = arith.constant dense<0.000000e+00> : vector<8x128xf32>
    %331 = tpu.matmul %330, %40, %cst_77 {dimension_numbers = #tpu.dot_dimension_numbers<[1], [0], [0], [1], [0, 0, 1, 1], [], []>} : vector<8x32xbf16>, vector<32x128xbf16>, vector<8x128xf32> -> vector<8x128xf32>
    %332 = arith.addf %329, %331 : vector<8x128xf32>
    %cst_78 = arith.constant 5.000000e-01 : f32
    %333 = vector.broadcast %cst_78 : f32 to vector<8x128xf32>
    %334 = arith.mulf %333, %332 : vector<8x128xf32>
    %335 = arith.select %39, %332, %334 : vector<8x128xi1>, vector<8x128xf32>
    %336 = math.tanh %335 : vector<8x128xf32>
    %cst_79 = arith.constant 5.000000e-01 : f32
    %337 = vector.broadcast %cst_79 : f32 to vector<8x128xf32>
    %338 = arith.mulf %337, %336 : vector<8x128xf32>
    %cst_80 = arith.constant 5.000000e-01 : f32
    %339 = vector.broadcast %cst_80 : f32 to vector<8x128xf32>
    %340 = arith.addf %338, %339 : vector<8x128xf32>
    %341 = arith.select %39, %336, %340 : vector<8x128xi1>, vector<8x128xf32>
    %342 = vector.extract_strided_slice %341 {offsets = [0, 0], sizes = [8, 32], strides = [1, 1]} : vector<8x128xf32> to vector<8x32xf32>
    %343 = vector.extract_strided_slice %341 {offsets = [0, 32], sizes = [8, 32], strides = [1, 1]} : vector<8x128xf32> to vector<8x32xf32>
    %344 = vector.extract_strided_slice %341 {offsets = [0, 64], sizes = [8, 32], strides = [1, 1]} : vector<8x128xf32> to vector<8x32xf32>
    %345 = vector.extract_strided_slice %341 {offsets = [0, 96], sizes = [8, 32], strides = [1, 1]} : vector<8x128xf32> to vector<8x32xf32>
    %346 = arith.mulf %343, %326 : vector<8x32xf32>
    %347 = arith.mulf %342, %344 : vector<8x32xf32>
    %348 = arith.addf %346, %347 : vector<8x32xf32>
    %349 = math.tanh %348 : vector<8x32xf32>
    %350 = arith.mulf %345, %349 : vector<8x32xf32>
    %351 = vector.extract_strided_slice %33 {offsets = [112, 0], sizes = [8, 128], strides = [1, 1]} : vector<128x128xf32> to vector<8x128xf32>
    %352 = arith.truncf %350 : vector<8x32xf32> to vector<8x32xbf16>
    %cst_81 = arith.constant dense<0.000000e+00> : vector<8x128xf32>
    %353 = tpu.matmul %352, %40, %cst_81 {dimension_numbers = #tpu.dot_dimension_numbers<[1], [0], [0], [1], [0, 0, 1, 1], [], []>} : vector<8x32xbf16>, vector<32x128xbf16>, vector<8x128xf32> -> vector<8x128xf32>
    %354 = arith.addf %351, %353 : vector<8x128xf32>
    %cst_82 = arith.constant 5.000000e-01 : f32
    %355 = vector.broadcast %cst_82 : f32 to vector<8x128xf32>
    %356 = arith.mulf %355, %354 : vector<8x128xf32>
    %357 = arith.select %39, %354, %356 : vector<8x128xi1>, vector<8x128xf32>
    %358 = math.tanh %357 : vector<8x128xf32>
    %cst_83 = arith.constant 5.000000e-01 : f32
    %359 = vector.broadcast %cst_83 : f32 to vector<8x128xf32>
    %360 = arith.mulf %359, %358 : vector<8x128xf32>
    %cst_84 = arith.constant 5.000000e-01 : f32
    %361 = vector.broadcast %cst_84 : f32 to vector<8x128xf32>
    %362 = arith.addf %360, %361 : vector<8x128xf32>
    %363 = arith.select %39, %358, %362 : vector<8x128xi1>, vector<8x128xf32>
    %364 = vector.extract_strided_slice %363 {offsets = [0, 0], sizes = [8, 32], strides = [1, 1]} : vector<8x128xf32> to vector<8x32xf32>
    %365 = vector.extract_strided_slice %363 {offsets = [0, 32], sizes = [8, 32], strides = [1, 1]} : vector<8x128xf32> to vector<8x32xf32>
    %366 = vector.extract_strided_slice %363 {offsets = [0, 64], sizes = [8, 32], strides = [1, 1]} : vector<8x128xf32> to vector<8x32xf32>
    %367 = vector.extract_strided_slice %363 {offsets = [0, 96], sizes = [8, 32], strides = [1, 1]} : vector<8x128xf32> to vector<8x32xf32>
    %368 = arith.mulf %365, %348 : vector<8x32xf32>
    %369 = arith.mulf %364, %366 : vector<8x32xf32>
    %370 = arith.addf %368, %369 : vector<8x32xf32>
    %371 = math.tanh %370 : vector<8x32xf32>
    %372 = arith.mulf %367, %371 : vector<8x32xf32>
    %373 = vector.extract_strided_slice %33 {offsets = [120, 0], sizes = [8, 128], strides = [1, 1]} : vector<128x128xf32> to vector<8x128xf32>
    %374 = arith.truncf %372 : vector<8x32xf32> to vector<8x32xbf16>
    %cst_85 = arith.constant dense<0.000000e+00> : vector<8x128xf32>
    %375 = tpu.matmul %374, %40, %cst_85 {dimension_numbers = #tpu.dot_dimension_numbers<[1], [0], [0], [1], [0, 0, 1, 1], [], []>} : vector<8x32xbf16>, vector<32x128xbf16>, vector<8x128xf32> -> vector<8x128xf32>
    %376 = arith.addf %373, %375 : vector<8x128xf32>
    %cst_86 = arith.constant 5.000000e-01 : f32
    %377 = vector.broadcast %cst_86 : f32 to vector<8x128xf32>
    %378 = arith.mulf %377, %376 : vector<8x128xf32>
    %379 = arith.select %39, %376, %378 : vector<8x128xi1>, vector<8x128xf32>
    %380 = math.tanh %379 : vector<8x128xf32>
    %cst_87 = arith.constant 5.000000e-01 : f32
    %381 = vector.broadcast %cst_87 : f32 to vector<8x128xf32>
    %382 = arith.mulf %381, %380 : vector<8x128xf32>
    %cst_88 = arith.constant 5.000000e-01 : f32
    %383 = vector.broadcast %cst_88 : f32 to vector<8x128xf32>
    %384 = arith.addf %382, %383 : vector<8x128xf32>
    %385 = arith.select %39, %380, %384 : vector<8x128xi1>, vector<8x128xf32>
    %386 = vector.extract_strided_slice %385 {offsets = [0, 0], sizes = [8, 32], strides = [1, 1]} : vector<8x128xf32> to vector<8x32xf32>
    %387 = vector.extract_strided_slice %385 {offsets = [0, 32], sizes = [8, 32], strides = [1, 1]} : vector<8x128xf32> to vector<8x32xf32>
    %388 = vector.extract_strided_slice %385 {offsets = [0, 64], sizes = [8, 32], strides = [1, 1]} : vector<8x128xf32> to vector<8x32xf32>
    %389 = vector.extract_strided_slice %385 {offsets = [0, 96], sizes = [8, 32], strides = [1, 1]} : vector<8x128xf32> to vector<8x32xf32>
    %390 = arith.mulf %387, %370 : vector<8x32xf32>
    %391 = arith.mulf %386, %388 : vector<8x32xf32>
    %392 = arith.addf %390, %391 : vector<8x32xf32>
    %393 = math.tanh %392 : vector<8x32xf32>
    %394 = arith.mulf %389, %393 : vector<8x32xf32>
    %c0_89 = arith.constant 0 : index
    %c0_90 = arith.constant 0 : index
    %395 = vector.load %arg7[%c0_89, %c0_90] : memref<32x4xf32, #tpu.memory_space<vmem>>, vector<32x4xf32>
    %cst_91 = arith.constant dense<0.000000e+00> : vector<8x4xf32>
    %396 = tpu.matmul %394, %395, %cst_91 {dimension_numbers = #tpu.dot_dimension_numbers<[1], [0], [0], [1], [0, 0, 1, 1], [], []>} : vector<8x32xf32>, vector<32x4xf32>, vector<8x4xf32> -> vector<8x4xf32>
    %c0_92 = arith.constant 0 : index
    %c0_93 = arith.constant 0 : index
    %397 = vector.load %arg8[%c0_92, %c0_93] : memref<1x4xf32, #tpu.memory_space<vmem>>, vector<1x4xf32>
    %398 = vector.broadcast %397 : vector<1x4xf32> to vector<8x4xf32>
    %399 = arith.addf %396, %398 : vector<8x4xf32>
    %c0_94 = arith.constant 0 : index
    %c0_95 = arith.constant 0 : index
    %c0_96 = arith.constant 0 : index
    %400 = vector.load %arg9[%c0_94, %c0_95, %c0_96] : memref<1x8x4xf32, #tpu.memory_space<vmem>>, vector<1x8x4xf32>
    %401 = vector.shape_cast %400 : vector<1x8x4xf32> to vector<8x4xf32>
    %402 = vector.shape_cast %399 : vector<8x4xf32> to vector<1x8x4xf32>
    tpu.vector_store %arg9[%c0_94, %c0_95, %c0_96], %402 {strides = array<i32>} : memref<1x8x4xf32, #tpu.memory_space<vmem>>, vector<1x8x4xf32>,
    return
  }
  func.func @transform_0(%arg0: i32) -> (i32, i32, i32) {
    %c0_i32 = arith.constant 0 : i32
    %c0_i32_0 = arith.constant 0 : i32
    %c0_i32_1 = arith.constant 0 : i32
    return %arg0, %c0_i32, %c0_i32_0 : i32, i32, i32
  }
  func.func @transform_1(%arg0: i32) -> (i32, i32, i32) {
    %c0_i32 = arith.constant 0 : i32
    %c0_i32_0 = arith.constant 0 : i32
    %c0_i32_1 = arith.constant 0 : i32
    %c0_i32_2 = arith.constant 0 : i32
    return %c0_i32, %c0_i32_0, %c0_i32_1 : i32, i32, i32
  }
  func.func @transform_2(%arg0: i32) -> (i32, i32) {
    %c0_i32 = arith.constant 0 : i32
    %c0_i32_0 = arith.constant 0 : i32
    %c0_i32_1 = arith.constant 0 : i32
    return %c0_i32, %c0_i32_0 : i32, i32
  }
  func.func @transform_3(%arg0: i32) -> (i32, i32) {
    %c0_i32 = arith.constant 0 : i32
    %c0_i32_0 = arith.constant 0 : i32
    %c0_i32_1 = arith.constant 0 : i32
    return %c0_i32, %c0_i32_0 : i32, i32
  }
  func.func @transform_4(%arg0: i32) -> (i32, i32) {
    %c0_i32 = arith.constant 0 : i32
    %c0_i32_0 = arith.constant 0 : i32
    %c0_i32_1 = arith.constant 0 : i32
    return %c0_i32, %c0_i32_0 : i32, i32
  }
  func.func @transform_5(%arg0: i32) -> (i32, i32) {
    %c0_i32 = arith.constant 0 : i32
    %c0_i32_0 = arith.constant 0 : i32
    %c0_i32_1 = arith.constant 0 : i32
    return %c0_i32, %c0_i32_0 : i32, i32
  }
  func.func @transform_6(%arg0: i32) -> (i32, i32) {
    %c0_i32 = arith.constant 0 : i32
    %c0_i32_0 = arith.constant 0 : i32
    %c0_i32_1 = arith.constant 0 : i32
    return %c0_i32, %c0_i32_0 : i32, i32
  }
  func.func @transform_7(%arg0: i32) -> (i32, i32) {
    %c0_i32 = arith.constant 0 : i32
    %c0_i32_0 = arith.constant 0 : i32
    %c0_i32_1 = arith.constant 0 : i32
    return %c0_i32, %c0_i32_0 : i32, i32
  }
  func.func @transform_8(%arg0: i32) -> (i32, i32, i32) {
    %c0_i32 = arith.constant 0 : i32
    %c0_i32_0 = arith.constant 0 : i32
    %c0_i32_1 = arith.constant 0 : i32
    return %arg0, %c0_i32, %c0_i32_0 : i32, i32, i32
  }
}

</mosaic_0001>

<bundles_post_ra>
// kernel: cnn_feed_lstm_forward.1
= control target key start
LH: loop header
LB: loop body
LE: loop exit
PB: predicated region body
PF: predicated region fallthrough
CT: control target
= control target key end

     0   :  { %vm90_vm0 = vcmask 1041408   ;;  %vm65_vm1 = vcmask 31744   ;;  %v1311_v10 = vmov 0.0   ;;  %vm367_vm2 = vcmask 1043456   ;;  %s1314_s25 = smov 32   ;;  %s1736_s1 = inlined_call_operand.vmem [shape: bf16[3,4,8], index: 1, kind: input, shape index: {}]   ;;  %s1737_s0 = inlined_call_operand.vmem [shape: f32[1,128,4], index: 0, kind: input, shape index: {}]   ;;  %s1738_s5 = inlined_call_operand.vmem [shape: bf16[32,128], index: 5, kind: input, shape index: {}]   ;;  %s1739_s2 = inlined_call_operand.vmem [shape: f32[1,8], index: 2, kind: input, shape index: {}]   ;;  %s1740_s3 = inlined_call_operand.vmem [shape: bf16[8,128], index: 3, kind: input, shape index: {}]   ;;  %s1741_s4 = inlined_call_operand.vmem [shape: f32[1,128], index: 4, kind: input, shape index: {}]   ;;  %s1742_s6 = inlined_call_operand.vmem [shape: f32[32,4], index: 6, kind: input, shape index: {}]   ;;  %s1743_s7 = inlined_call_operand.vmem [shape: f32[1,4], index: 7, kind: input, shape index: {}]   ;;  %s1744_s8 = inlined_call_operand.vmem [shape: f32[1,8,4], index: 8, kind: output, shape index: {}]  }
   0x1   :  { %v1180_v0 = vld [vmem:[%s1736_s1 + $0x2] sm:$0x3]  ;;  %v54_v1 = vld [vmem:[%s1736_s1] sm:$0x3]  ;;  %v1197_v2 = vld [vmem:[%s1736_s1 + $0x4] sm:$0x3] }
   0x2   :  { %v92_v3 = vsel %vm90_vm0, %v1180_v0, 0  ;;  %v168_v4 = vsel %vm90_vm0, %v54_v1, 0  ;;  %v226_v5 = vsel %vm90_vm0, %v1197_v2, 0  ;;  %v30_v6 = vld [vmem:[%s1737_s0] sm:$0xff]  ;;  %v31_v7 = vld [vmem:[%s1737_s0 + $0x8] sm:$0xff]  ;;  %v32_v8 = vld [vmem:[%s1737_s0 + $0x10] sm:$0xff] }
   0x3   :  { %101 = vmatpush.bf16.msra.mxu0 %v92_v3  ;;  %177 = vmatpush.bf16.msra.mxu1 %v168_v4  ;;  %v55_v9 = vpack.c.bf16 %v31_v7, %v30_v6  ;;  %v46_v11 = vpack.c.bf16 %v30_v6, %v1311_v10  ;;  %v47_v12 = vpack.c.bf16 %v32_v8, %v31_v7  ;;  %v1381_v13 = vld [vmem:[%s1738_s5 + $0x8] sm:$0xff]  ;;  %v33_v14 = vld [vmem:[%s1737_s0 + $0x18] sm:$0xff]  ;;  %v34_v15 = vld [vmem:[%s1737_s0 + $0x20] sm:$0xff]  ;;  %v1312_v46 = vmov 0  }
   0x4   :  { %235 = vmatpush.bf16.msra.mxu2 %v226_v5  ;;  %v56_v16 = vpack.c.bf16 %v33_v14, %v32_v8  ;;  %v48_v17 = vpack.c.bf16 %v34_v15, %v33_v14  ;;  %v35_v18 = vld [vmem:[%s1737_s0 + $0x28] sm:$0xff]  ;;  %v36_v19 = vld [vmem:[%s1737_s0 + $0x30] sm:$0xff]  ;;  %v37_v22 = vld [vmem:[%s1737_s0 + $0x38] sm:$0xff]  ;;  %vm342_vm3 = vcmask 64512   ;;  %vm441_vm7 = vcmask 261120  }
   0x5   :  { %v57_v20 = vpack.c.bf16 %v35_v18, %v34_v15  ;;  %v49_v21 = vpack.c.bf16 %v36_v19, %v35_v18  ;;  %v38_v23 = vld [vmem:[%s1737_s0 + $0x40] sm:$0xff]  ;;  %v58_v24 = vpack.c.bf16 %v37_v22, %v36_v19  ;;  %v39_v27 = vld [vmem:[%s1737_s0 + $0x48] sm:$0xff]  ;;  %v40_v28 = vld [vmem:[%s1737_s0 + $0x50] sm:$0xff] }
   0x6   :  { %1181 = vmatmul.msk.bf16.vlgmr.msra.gmra.mxu0 %vm65_vm1, %v55_v9  ;;  %1189 = vmatmul.msk.bf16.vlgmr.msra.gmra.mxu1 %vm65_vm1, %v46_v11  ;;  %v50_v25 = vpack.c.bf16 %v38_v23, %v37_v22  ;;  %v1419_v26 = vld [vmem:[%s1738_s5] sm:$0xff]  ;;  %v59_v29 = vpack.c.bf16 %v39_v27, %v38_v23  ;;  %v51_v30 = vpack.c.bf16 %v40_v28, %v39_v27  ;;  %v41_v31 = vld [vmem:[%s1737_s0 + $0x58] sm:$0xff]  ;;  %v43_v35 = vld [vmem:[%s1737_s0 + $0x68] sm:$0xff] }
   0x7   :  { %451 = vmatpush.bf16.msrb.mxu0 %v1381_v13  ;;  %495 = vmatpush.bf16.msrb.mxu1 %v1381_v13  ;;  %v42_v32 = vld [vmem:[%s1737_s0 + $0x60] sm:$0xff]  ;;  %v60_v33 = vpack.c.bf16 %v41_v31, %v40_v28  ;;  %v44_v36 = vld [vmem:[%s1737_s0 + $0x70] sm:$0xff]  ;;  %v45_v39 = vld [vmem:[%s1737_s0 + $0x78] sm:$0xff] }
   0x8   :  { %1198 = vmatmul.msk.bf16.vlgmr.msra.gmra.mxu2 %vm65_vm1, %v47_v12  ;;  %v52_v34 = vpack.c.bf16 %v42_v32, %v41_v31  ;;  %v61_v37 = vpack.c.bf16 %v43_v35, %v42_v32  ;;  %v53_v38 = vpack.c.bf16 %v44_v36, %v43_v35  ;;  %v62_v40 = vpack.c.bf16 %v45_v39, %v44_v36  ;;  %v337_v42 = vld [vmem:[%s1740_s3] sm:$0xf] }
   0x9   :  { %539 = vmatpush.bf16.msrb.mxu2 %v1381_v13  ;;  %v219_v41 = vpack.c.bf16 0.0, %v45_v39  ;;  %v369_v43 = vsel %vm367_vm2, %v337_v42, 0  ;;  %v1473_v52 = vld [vmem:[%s1739_s2] ss:$0 sm:$0xff] }
   0xa   :  { %378 = vmatpush.bf16.msra.mxu3 %v369_v43 }
   0xb   :  { %452 = vmatpush.bf16.msrb.mxu0 %v1419_v26  ;;  %496 = vmatpush.bf16.msrb.mxu1 %v1419_v26 }
   0xd   :  { %540 = vmatpush.bf16.msrb.mxu2 %v1419_v26 }
   0xe   :  { %583 = vmatpush.bf16.msrb.mxu3 %v1381_v13 }
   0xf   :  { %627 = vmatpush.bf16.msra.mxu0 %v1381_v13  ;;  %671 = vmatpush.bf16.msra.mxu1 %v1381_v13 }
  0x11   :  { %715 = vmatpush.bf16.msra.mxu2 %v1381_v13 }
  0x12   :  { %584 = vmatpush.bf16.msrb.mxu3 %v1419_v26 }
  0x13   :  { %628 = vmatpush.bf16.msra.mxu0 %v1419_v26  ;;  %672 = vmatpush.bf16.msra.mxu1 %v1419_v26 }
  0x15   :  { %716 = vmatpush.bf16.msra.mxu2 %v1419_v26 }
  0x16   :  { %1182 = vmatmul.msk.bf16.gmra.mxu0 %vm65_vm1, %v56_v16  ;;  %1190 = vmatmul.msk.bf16.gmra.mxu1 %vm65_vm1, %v47_v12 }
  0x18   :  { %1199 = vmatmul.msk.bf16.gmra.mxu2 %vm65_vm1, %v48_v17 }
  0x26   :  { %1183 = vmatmul.msk.bf16.gmra.mxu0 %vm65_vm1, %v57_v20  ;;  %1191 = vmatmul.msk.bf16.gmra.mxu1 %vm65_vm1, %v48_v17 }
  0x28   :  { %1200 = vmatmul.msk.bf16.gmra.mxu2 %vm65_vm1, %v49_v21 }
  0x36   :  { %1184 = vmatmul.msk.bf16.gmra.mxu0 %vm65_vm1, %v58_v24  ;;  %1192 = vmatmul.msk.bf16.gmra.mxu1 %vm65_vm1, %v49_v21 }
  0x38   :  { %1201 = vmatmul.msk.bf16.gmra.mxu2 %vm65_vm1, %v50_v25 }
  0x46   :  { %1185 = vmatmul.msk.bf16.gmra.mxu0 %vm65_vm1, %v59_v29  ;;  %1193 = vmatmul.msk.bf16.gmra.mxu1 %vm65_vm1, %v50_v25 }
  0x48   :  { %1202 = vmatmul.msk.bf16.gmra.mxu2 %vm65_vm1, %v51_v30 }
  0x56   :  { %1186 = vmatmul.msk.bf16.gmra.mxu0 %vm65_vm1, %v60_v33  ;;  %1194 = vmatmul.msk.bf16.gmra.mxu1 %vm65_vm1, %v51_v30 }
  0x58   :  { %1203 = vmatmul.msk.bf16.gmra.mxu2 %vm65_vm1, %v52_v34 }
  0x66   :  { %1187 = vmatmul.msk.bf16.gmra.mxu0 %vm65_vm1, %v61_v37  ;;  %1195 = vmatmul.msk.bf16.gmra.mxu1 %vm65_vm1, %v52_v34 }
  0x68   :  { %1204 = vmatmul.msk.bf16.gmra.mxu2 %vm65_vm1, %v53_v38 }
  0x76   :  { %1188 = vmatmul.msk.bf16.gmra.mxu0 %vm65_vm1, %v62_v40  ;;  %1196 = vmatmul.msk.bf16.gmra.mxu1 %vm65_vm1, %v53_v38 }
  0x78   :  { %1205 = vmatmul.msk.bf16.gmra.mxu2 %vm65_vm1, %v219_v41 }
  0x83   :  { %v103_v44 = vpop.f32.mrf.mxu0  ;;  %v179_v45 = vpop.f32.mrf.mxu1 }
  0x84   :  { %v180_v48 = vadd.f32 %v179_v45, %v103_v44 }
  0x86   :  { %453 = vmatmul.bf16.vlgmr.msrb.gmra.mxu0 %v1312_v46 }
  0x87   :  { %803 = vmatpush.bf16.msrb.mxu0 %v1381_v13 }
  0x8b   :  { %v237_v47 = vpop.f32.mrf.mxu2  ;;  %v105_v49 = vpop.f32.mrf.mxu0  ;;  %804 = vmatpush.bf16.msrb.mxu0 %v1419_v26 }
  0x8c   :  { %v181_v50 = vpop.f32.mrf.mxu1  ;;  %v277_v51 = vadd.f32 %v237_v47, %v180_v48 }
  0x8d   :  { %v182_v53 = vadd.f32 %v181_v50, %v105_v49 }
  0x8e   :  { %v297_v55 = vadd.f32 %v1473_v52, %v277_v51 }
  0x90   :  { %v313_v60 = vmax.f32 %v297_v55, 0.0 }
  0x93   :  { %v239_v54 = vpop.f32.mrf.mxu2  ;;  %v108_v57 = vpop.f32.mrf.mxu0 }
  0x94   :  { %v278_v56 = vadd.f32 %v239_v54, %v182_v53  ;;  %v184_v58 = vpop.f32.mrf.mxu1 }
  0x95   :  { %v185_v63 = vadd.f32 %v184_v58, %v108_v57 }
  0x96   :  { %v298_v59 = vadd.f32 %v1473_v52, %v278_v56 }
  0x98   :  { %v314_v61 = vmax.f32 %v298_v59, 0.0 }
  0x9a   :  { %v329_v62 = vpack.c.bf16 %v314_v61, %v313_v60 }
  0x9b   :  { %v242_v0 = vpop.f32.mrf.mxu2  ;;  %v110_v1 = vpop.f32.mrf.mxu0 }
  0x9c   :  { %1206 = vmatmul.msk.bf16.vlgmr.msra.gmra.mxu3 %vm342_vm3, %v329_v62  ;;  %v186_v2 = vpop.f32.mrf.mxu1  ;;  %v279_v3 = vadd.f32 %v242_v0, %v185_v63 }
  0x9d   :  { %759 = vmatpush.bf16.msra.mxu3 %v1381_v13  ;;  %v187_v4 = vadd.f32 %v186_v2, %v110_v1 }
  0x9e   :  { %v299_v5 = vadd.f32 %v1473_v52, %v279_v3 }
  0xa0   :  { %v315_v10 = vmax.f32 %v299_v5, 0.0 }
  0xa1   :  { %760 = vmatpush.bf16.msra.mxu3 %v1419_v26 }
  0xa3   :  { %v244_v6 = vpop.f32.mrf.mxu2  ;;  %v113_v8 = vpop.f32.mrf.mxu0 }
  0xa4   :  { %v280_v7 = vadd.f32 %v244_v6, %v187_v4  ;;  %v189_v9 = vpop.f32.mrf.mxu1 }
  0xa5   :  { %v190_v14 = vadd.f32 %v189_v9, %v113_v8 }
  0xa6   :  { %v300_v11 = vadd.f32 %v1473_v52, %v280_v7 }
  0xa8   :  { %v316_v12 = vmax.f32 %v300_v11, 0.0 }
  0xaa   :  { %v330_v15 = vpack.c.bf16 %v316_v12, %v315_v10 }
  0xab   :  { %v247_v16 = vpop.f32.mrf.mxu2  ;;  %v115_v17 = vpop.f32.mrf.mxu0 }
  0xac   :  { %1207 = vmatmul.msk.bf16.gmra.mxu3 %vm342_vm3, %v330_v15  ;;  %v191_v18 = vpop.f32.mrf.mxu1  ;;  %v281_v19 = vadd.f32 %v247_v16, %v190_v14 }
  0xad   :  { %v192_v20 = vadd.f32 %v191_v18, %v115_v17 }
  0xae   :  { %v301_v21 = vadd.f32 %v1473_v52, %v281_v19 }
  0xb0   :  { %v317_v27 = vmax.f32 %v301_v21, 0.0 }
  0xb3   :  { %v249_v22 = vpop.f32.mrf.mxu2  ;;  %v118_v24 = vpop.f32.mrf.mxu0 }
  0xb4   :  { %v282_v23 = vadd.f32 %v249_v22, %v192_v20  ;;  %v194_v25 = vpop.f32.mrf.mxu1 }
  0xb5   :  { %v195_v30 = vadd.f32 %v194_v25, %v118_v24 }
  0xb6   :  { %v302_v28 = vadd.f32 %v1473_v52, %v282_v23 }
  0xb8   :  { %v318_v29 = vmax.f32 %v302_v28, 0.0 }
  0xba   :  { %v331_v31 = vpack.c.bf16 %v318_v29, %v317_v27 }
  0xbb   :  { %v252_v32 = vpop.f32.mrf.mxu2  ;;  %v120_v33 = vpop.f32.mrf.mxu0 }
  0xbc   :  { %1208 = vmatmul.msk.bf16.gmra.mxu3 %vm342_vm3, %v331_v31  ;;  %v196_v34 = vpop.f32.mrf.mxu1  ;;  %v283_v35 = vadd.f32 %v252_v32, %v195_v30 }
  0xbd   :  { %v197_v36 = vadd.f32 %v196_v34, %v120_v33 }
  0xbe   :  { %v303_v37 = vadd.f32 %v1473_v52, %v283_v35 }
  0xc0   :  { %v319_v42 = vmax.f32 %v303_v37, 0.0 }
  0xc3   :  { %v254_v38 = vpop.f32.mrf.mxu2  ;;  %v123_v40 = vpop.f32.mrf.mxu0 }
  0xc4   :  { %v284_v39 = vadd.f32 %v254_v38, %v197_v36  ;;  %v199_v41 = vpop.f32.mrf.mxu1 }
  0xc5   :  { %v200_v45 = vadd.f32 %v199_v41, %v123_v40 }
  0xc6   :  { %v304_v43 = vadd.f32 %v1473_v52, %v284_v39 }
  0xc8   :  { %v320_v44 = vmax.f32 %v304_v43, 0.0 }
  0xca   :  { %v332_v46 = vpack.c.bf16 %v320_v44, %v319_v42 }
  0xcb   :  { %v257_v47 = vpop.f32.mrf.mxu2  ;;  %v125_v48 = vpop.f32.mrf.mxu0 }
  0xcc   :  { %1209 = vmatmul.msk.bf16.gmra.mxu3 %vm342_vm3, %v332_v46  ;;  %v201_v49 = vpop.f32.mrf.mxu1  ;;  %v285_v50 = vadd.f32 %v257_v47, %v200_v45  ;;  %v420_v45 = vlaneseq  ;;  %v1504_v46 = vld [vmem:[%s1741_s4] ss:$0 sm:$0xff]  ;;  %s1313_s4 = smov 64  }
  0xcd   :  { %v202_v51 = vadd.f32 %v201_v49, %v125_v48 }
  0xce   :  { %v305_v53 = vadd.f32 %v1473_v52, %v285_v50  ;;  %v421_v47 = vand.u32 127, %v420_v45 }
  0xd0   :  { %v321_v58 = vmax.f32 %v305_v53, 0.0  ;;  %vm422_vm4 = vcmp.ge.s32.totalorder %v421_v47, 64  ;;  %vm423_vm5 = vcmp.lt.s32.totalorder %v421_v47, 96 }
  0xd1   :  { %vm1507_vm6 = vmand %vm422_vm4, %vm423_vm5 }
  0xd3   :  { %v259_v54 = vpop.f32.mrf.mxu2  ;;  %v128_v56 = vpop.f32.mrf.mxu0 }
  0xd4   :  { %v286_v55 = vadd.f32 %v259_v54, %v202_v51  ;;  %v204_v57 = vpop.f32.mrf.mxu1 }
  0xd5   :  { %v205_v61 = vadd.f32 %v204_v57, %v128_v56 }
  0xd6   :  { %v306_v59 = vadd.f32 %v1473_v52, %v286_v55 }
  0xd8   :  { %v322_v60 = vmax.f32 %v306_v59, 0.0 }
  0xda   :  { %v333_v62 = vpack.c.bf16 %v322_v60, %v321_v58 }
  0xdb   :  { %v262_v63 = vpop.f32.mrf.mxu2  ;;  %v130_v0 = vpop.f32.mrf.mxu0 }
  0xdc   :  { %1210 = vmatmul.msk.bf16.gmra.mxu3 %vm342_vm3, %v333_v62  ;;  %v206_v1 = vpop.f32.mrf.mxu1  ;;  %v287_v2 = vadd.f32 %v262_v63, %v205_v61 }
  0xdd   :  { %v207_v3 = vadd.f32 %v206_v1, %v130_v0 }
  0xde   :  { %v307_v4 = vadd.f32 %v1473_v52, %v287_v2 }
  0xe0   :  { %v323_v9 = vmax.f32 %v307_v4, 0.0 }
  0xe3   :  { %v264_v5 = vpop.f32.mrf.mxu2  ;;  %v133_v7 = vpop.f32.mrf.mxu0 }
  0xe4   :  { %v288_v6 = vadd.f32 %v264_v5, %v207_v3  ;;  %v209_v8 = vpop.f32.mrf.mxu1 }
  0xe5   :  { %v210_v12 = vadd.f32 %v209_v8, %v133_v7 }
  0xe6   :  { %v308_v10 = vadd.f32 %v1473_v52, %v288_v6 }
  0xe8   :  { %v324_v11 = vmax.f32 %v308_v10, 0.0 }
  0xea   :  { %v334_v14 = vpack.c.bf16 %v324_v11, %v323_v9 }
  0xeb   :  { %v267_v15 = vpop.f32.mrf.mxu2  ;;  %v135_v16 = vpop.f32.mrf.mxu0 }
  0xec   :  { %1211 = vmatmul.msk.bf16.gmra.mxu3 %vm342_vm3, %v334_v14  ;;  %v211_v17 = vpop.f32.mrf.mxu1  ;;  %v289_v18 = vadd.f32 %v267_v15, %v210_v12 }
  0xed   :  { %v212_v19 = vadd.f32 %v211_v17, %v135_v16 }
  0xee   :  { %v309_v20 = vadd.f32 %v1473_v52, %v289_v18 }
  0xf0   :  { %v325_v25 = vmax.f32 %v309_v20, 0.0 }
  0xf3   :  { %v269_v21 = vpop.f32.mrf.mxu2  ;;  %v138_v23 = vpop.f32.mrf.mxu0 }
  0xf4   :  { %v290_v22 = vadd.f32 %v269_v21, %v212_v19  ;;  %v214_v24 = vpop.f32.mrf.mxu1 }
  0xf5   :  { %v215_v29 = vadd.f32 %v214_v24, %v138_v23 }
  0xf6   :  { %v310_v27 = vadd.f32 %v1473_v52, %v290_v22 }
  0xf8   :  { %v326_v28 = vmax.f32 %v310_v27, 0.0 }
  0xfa   :  { %v335_v30 = vpack.c.bf16 %v326_v28, %v325_v25 }
  0xfb   :  { %v272_v31 = vpop.f32.mrf.mxu2  ;;  %v140_v32 = vpop.f32.mrf.mxu0 }
  0xfc   :  { %1212 = vmatmul.msk.bf16.gmra.mxu3 %vm342_vm3, %v335_v30  ;;  %v216_v33 = vpop.f32.mrf.mxu1  ;;  %v291_v34 = vadd.f32 %v272_v31, %v215_v29 }
  0xfd   :  { %v217_v35 = vadd.f32 %v216_v33, %v140_v32 }
  0xfe   :  { %v311_v36 = vadd.f32 %v1473_v52, %v291_v34 }
 0x100   :  { %v327_v40 = vmax.f32 %v311_v36, 0.0 }
 0x103   :  { %v274_v37 = vpop.f32.mrf.mxu2  ;;  %v454_v39 = vpop.f32.mrf.mxu0 }
 0x104   :  { %v292_v38 = vadd.f32 %v274_v37, %v217_v35 }
 0x106   :  { %v312_v41 = vadd.f32 %v1473_v52, %v292_v38  ;;  %v1144_v52 = vld [vmem:[%s1742_s6 + $0x10] sm:$0xff] }
 0x108   :  { %v328_v42 = vmax.f32 %v312_v41, 0.0 }
 0x10a   :  { %v336_v43 = vpack.c.bf16 %v328_v42, %v327_v40 }
 0x10b   :  { %v456_v44 = vpop.f32.mrf.mxu0 }
 0x10c   :  { %1213 = vmatmul.msk.bf16.gmra.mxu3 %vm342_vm3, %v336_v43 }
 0x11f   :  { %v380_v48 = vpop.f32.mrf.mxu3 }
 0x120   :  { %v381_v49 = vadd.f32 %v1504_v46, %v380_v48 }
 0x122   :  { %v458_v50 = vadd.f32 %v454_v39, %v381_v49 }
 0x124   :  { %v459_v51 = vmul.f32 0.5, %v458_v50 }
 0x126   :  { %v460_v53 = vsel %vm1507_vm6, %v458_v50, %v459_v51 }
 0x127   :  { %1247 = vtanh.f32 %v460_v53  ;;  %v382_v4 = vpop.f32.mrf.mxu3 }
 0x128   :  { %v383_v5 = vadd.f32 %v1504_v46, %v382_v4 }
 0x12d   :  { %v1248_v54 = vpop.eup %1247 }
 0x12e   :  { %v462_v55 = vmul.f32 0.5, %v1248_v54 }
 0x12f   :  { %v385_v27 = vpop.f32.mrf.mxu3 }
 0x130   :  { %v463_v56 = vadd.f32 0.5, %v462_v55  ;;  %v386_v28 = vadd.f32 %v1504_v46, %v385_v27 }
 0x132   :  { %v464_v57 = vsel %vm1507_vm6, %v1248_v54, %v463_v56 }
 0x133   :  { %467 = vrot.lane.b32.xlu0 %v464_v57, %s1313_s4  ;;  %v465_v60 = vmul.f32 0.0, %v464_v57 }
 0x137   :  { %v387_v49 = vpop.f32.mrf.mxu3 }
 0x13f   :  { %v390_v50 = vpop.f32.mrf.mxu3 }
 0x147   :  { %v1546_v51 = vpop.f32.mrf.mxu3 }
 0x14f   :  { %v1548_v53 = vpop.f32.mrf.mxu3 }
 0x157   :  { %v1550_v54 = vpop.f32.mrf.mxu3 }
 0x15f   :  { %v1552_v55 = vpop.f32.mrf.mxu3 }
 0x167   :  { %v1554_v56 = vpop.f32.mrf.mxu3 }
 0x1a5   :  { %v468_v58 = vpop.permute.xlu0 %467 }
 0x1a6   :  { %v470_v59 = vmul.f32 %v468_v58, %v464_v57 }
 0x1a8   :  { %472 = vrot.lane.b32.xlu0 %v470_v59, %s1314_s25 }
 0x21a   :  { %v473_v61 = vpop.permute.xlu0 %472 }
 0x21b   :  { %v475_v62 = vadd.f32 %v473_v61, %v465_v60 }
 0x21d   :  { %1249 = vtanh.f32 %v475_v62 }
 0x223   :  { %v1250_v63 = vpop.eup %1249 }
 0x224   :  { %478 = vrot.lane.b32.xlu1 %v1250_v63, %s1313_s4  ;;  %v388_v63 = vadd.f32 %v1504_v46, %v387_v49 }
 0x296   :  { %v479_v0 = vpop.permute.xlu1 %478 }
 0x297   :  { %v481_v1 = vmul.f32 %v479_v0, %v464_v57  ;;  %v1556_v57 = vpop.f32.mrf.mxu3 }
 0x299   :  { %v482_v2 = vpack.c.bf16 %v481_v1, %v481_v1 }
 0x29b   :  { %484 = vrot.lane.b32.xlu1 %v482_v2, %s1314_s25 }
 0x29f   :  { %v1558_v58 = vpop.f32.mrf.mxu3 }
 0x2a7   :  { %v1560_v59 = vpop.f32.mrf.mxu3 }
 0x2af   :  { %v1562_v60 = vpop.f32.mrf.mxu3 }
 0x2b7   :  { %v1564_v61 = vpop.f32.mrf.mxu3 }
 0x30d   :  { %v485_v3 = vpop.permute.xlu1 %484 }
 0x30e   :  { %1222 = vmatmul.msk.bf16.vlgmr.msrb.gmra.mxu1 %vm441_vm7, %v485_v3 }
 0x30f   :  { %847 = vmatpush.bf16.msrb.mxu1 %v1381_v13 }
 0x313   :  { %848 = vmatpush.bf16.msrb.mxu1 %v1419_v26 }
 0x38b   :  { %v498_v6 = vpop.f32.mrf.mxu1 }
 0x38c   :  { %v502_v7 = vadd.f32 %v498_v6, %v383_v5 }
 0x38e   :  { %v503_v8 = vmul.f32 0.5, %v502_v7 }
 0x390   :  { %v504_v9 = vsel %vm1507_vm6, %v502_v7, %v503_v8 }
 0x391   :  { %1251 = vtanh.f32 %v504_v9 }
 0x393   :  { %v500_v10 = vpop.f32.mrf.mxu1 }
 0x397   :  { %v1252_v11 = vpop.eup %1251 }
 0x398   :  { %v506_v12 = vmul.f32 0.5, %v1252_v11 }
 0x39a   :  { %v507_v14 = vadd.f32 0.5, %v506_v12 }
 0x39c   :  { %v508_v15 = vsel %vm1507_vm6, %v1252_v11, %v507_v14 }
 0x39d   :  { %511 = vrot.lane.b32.xlu2 %v508_v15, %s1313_s4  ;;  %v509_v18 = vmul.f32 %v508_v15, %v475_v62  ;;  %v1566_v62 = vpop.f32.mrf.mxu3 }
 0x3f7   :  { %v512_v16 = vpop.permute.xlu2 %511 }
 0x3f8   :  { %v514_v17 = vmul.f32 %v512_v16, %v508_v15 }
 0x3fa   :  { %516 = vrot.lane.b32.xlu2 %v514_v17, %s1314_s25 }
 0x454   :  { %v517_v19 = vpop.permute.xlu2 %516 }
 0x455   :  { %v519_v20 = vadd.f32 %v517_v19, %v509_v18 }
 0x457   :  { %1253 = vtanh.f32 %v519_v20 }
 0x45d   :  { %v1254_v21 = vpop.eup %1253 }
 0x45e   :  { %522 = vrot.lane.b32.xlu0 %v1254_v21, %s1313_s4 }
 0x4d0   :  { %v523_v22 = vpop.permute.xlu0 %522 }
 0x4d1   :  { %v525_v23 = vmul.f32 %v523_v22, %v508_v15 }
 0x4d3   :  { %v526_v24 = vpack.c.bf16 %v525_v23, %v525_v23 }
 0x4d5   :  { %528 = vrot.lane.b32.xlu1 %v526_v24, %s1314_s25 }
 0x547   :  { %v529_v25 = vpop.permute.xlu1 %528 }
 0x548   :  { %1223 = vmatmul.msk.bf16.vlgmr.msrb.gmra.mxu2 %vm441_vm7, %v529_v25 }
 0x549   :  { %891 = vmatpush.bf16.msrb.mxu2 %v1381_v13 }
 0x54d   :  { %892 = vmatpush.bf16.msrb.mxu2 %v1419_v26 }
 0x5cb   :  { %v542_v29 = vpop.f32.mrf.mxu2 }
 0x5cc   :  { %v546_v30 = vadd.f32 %v542_v29, %v386_v28 }
 0x5ce   :  { %v547_v31 = vmul.f32 0.5, %v546_v30 }
 0x5d0   :  { %v548_v32 = vsel %vm1507_vm6, %v546_v30, %v547_v31 }
 0x5d1   :  { %1255 = vtanh.f32 %v548_v32 }
 0x5d3   :  { %v544_v33 = vpop.f32.mrf.mxu2 }
 0x5d7   :  { %v1256_v34 = vpop.eup %1255 }
 0x5d8   :  { %v550_v35 = vmul.f32 0.5, %v1256_v34 }
 0x5da   :  { %v551_v36 = vadd.f32 0.5, %v550_v35 }
 0x5dc   :  { %v552_v37 = vsel %vm1507_vm6, %v1256_v34, %v551_v36 }
 0x5dd   :  { %555 = vrot.lane.b32.xlu2 %v552_v37, %s1313_s4  ;;  %v553_v40 = vmul.f32 %v552_v37, %v519_v20  ;;  %v391_v20 = vadd.f32 %v1504_v46, %v390_v50 }
 0x637   :  { %v556_v38 = vpop.permute.xlu2 %555 }
 0x638   :  { %v558_v39 = vmul.f32 %v556_v38, %v552_v37 }
 0x63a   :  { %560 = vrot.lane.b32.xlu0 %v558_v39, %s1314_s25 }
 0x6ac   :  { %v561_v41 = vpop.permute.xlu0 %560 }
 0x6ad   :  { %v563_v42 = vadd.f32 %v561_v41, %v553_v40  ;;  %v393_v41 = vadd.f32 %v1504_v46, %v1546_v51 }
 0x6af   :  { %1257 = vtanh.f32 %v563_v42 }
 0x6b5   :  { %v1258_v43 = vpop.eup %1257 }
 0x6b6   :  { %566 = vrot.lane.b32.xlu1 %v1258_v43, %s1313_s4 }
 0x728   :  { %v567_v44 = vpop.permute.xlu1 %566 }
 0x729   :  { %v569_v45 = vmul.f32 %v567_v44, %v552_v37 }
 0x72b   :  { %v570_v47 = vpack.c.bf16 %v569_v45, %v569_v45 }
 0x72d   :  { %572 = vrot.lane.b32.xlu2 %v570_v47, %s1314_s25 }
 0x787   :  { %v573_v48 = vpop.permute.xlu2 %572 }
 0x788   :  { %1224 = vmatmul.msk.bf16.vlgmr.msrb.gmra.mxu3 %vm441_vm7, %v573_v48 }
 0x789   :  { %935 = vmatpush.bf16.msrb.mxu3 %v1381_v13 }
 0x78d   :  { %936 = vmatpush.bf16.msrb.mxu3 %v1419_v26 }
 0x80b   :  { %v586_v0 = vpop.f32.mrf.mxu3 }
 0x80c   :  { %v590_v1 = vadd.f32 %v586_v0, %v388_v63 }
 0x80e   :  { %v591_v2 = vmul.f32 0.5, %v590_v1 }
 0x810   :  { %v592_v3 = vsel %vm1507_vm6, %v590_v1, %v591_v2 }
 0x811   :  { %1259 = vtanh.f32 %v592_v3 }
 0x813   :  { %v588_v4 = vpop.f32.mrf.mxu3 }
 0x817   :  { %v1260_v5 = vpop.eup %1259 }
 0x818   :  { %v594_v6 = vmul.f32 0.5, %v1260_v5 }
 0x81a   :  { %v595_v7 = vadd.f32 0.5, %v594_v6 }
 0x81c   :  { %v596_v8 = vsel %vm1507_vm6, %v1260_v5, %v595_v7 }
 0x81d   :  { %599 = vrot.lane.b32.xlu0 %v596_v8, %s1313_s4  ;;  %v597_v11 = vmul.f32 %v596_v8, %v563_v42 }
 0x88f   :  { %v600_v9 = vpop.permute.xlu0 %599 }
 0x890   :  { %v602_v10 = vmul.f32 %v600_v9, %v596_v8  ;;  %v396_v9 = vadd.f32 %v1504_v46, %v1548_v53 }
 0x892   :  { %604 = vrot.lane.b32.xlu1 %v602_v10, %s1314_s25 }
 0x904   :  { %v605_v12 = vpop.permute.xlu1 %604 }
 0x905   :  { %v607_v14 = vadd.f32 %v605_v12, %v597_v11 }
 0x907   :  { %1261 = vtanh.f32 %v607_v14 }
 0x90d   :  { %v1262_v15 = vpop.eup %1261 }
 0x90e   :  { %610 = vrot.lane.b32.xlu2 %v1262_v15, %s1313_s4 }
 0x968   :  { %v611_v16 = vpop.permute.xlu2 %610 }
 0x969   :  { %v613_v17 = vmul.f32 %v611_v16, %v596_v8 }
 0x96b   :  { %v614_v18 = vpack.c.bf16 %v613_v17, %v613_v17 }
 0x96d   :  { %616 = vrot.lane.b32.xlu0 %v614_v18, %s1314_s25 }
 0x9df   :  { %v617_v19 = vpop.permute.xlu0 %616 }
 0x9e0   :  { %1225 = vmatmul.msk.bf16.vlgmr.msra.gmra.mxu0 %vm441_vm7, %v617_v19 }
 0x9e1   :  { %979 = vmatpush.bf16.msra.mxu0 %v1381_v13 }
 0x9e5   :  { %980 = vmatpush.bf16.msra.mxu0 %v1419_v26 }
 0xa5d   :  { %v630_v21 = vpop.f32.mrf.mxu0 }
 0xa5e   :  { %v634_v22 = vadd.f32 %v630_v21, %v391_v20 }
 0xa60   :  { %v635_v23 = vmul.f32 0.5, %v634_v22 }
 0xa62   :  { %v636_v24 = vsel %vm1507_vm6, %v634_v22, %v635_v23 }
 0xa63   :  { %1263 = vtanh.f32 %v636_v24 }
 0xa65   :  { %v632_v25 = vpop.f32.mrf.mxu0 }
 0xa69   :  { %v1264_v27 = vpop.eup %1263 }
 0xa6a   :  { %v638_v28 = vmul.f32 0.5, %v1264_v27 }
 0xa6c   :  { %v639_v29 = vadd.f32 0.5, %v638_v28 }
 0xa6e   :  { %v640_v30 = vsel %vm1507_vm6, %v1264_v27, %v639_v29 }
 0xa6f   :  { %643 = vrot.lane.b32.xlu1 %v640_v30, %s1313_s4  ;;  %v641_v33 = vmul.f32 %v640_v30, %v607_v14 }
 0xae1   :  { %v644_v31 = vpop.permute.xlu1 %643 }
 0xae2   :  { %v646_v32 = vmul.f32 %v644_v31, %v640_v30 }
 0xae4   :  { %648 = vrot.lane.b32.xlu2 %v646_v32, %s1314_s25 }
 0xb3e   :  { %v649_v34 = vpop.permute.xlu2 %648 }
 0xb3f   :  { %v651_v35 = vadd.f32 %v649_v34, %v641_v33 }
 0xb41   :  { %1265 = vtanh.f32 %v651_v35 }
 0xb47   :  { %v1266_v36 = vpop.eup %1265 }
 0xb48   :  { %654 = vrot.lane.b32.xlu0 %v1266_v36, %s1313_s4 }
 0xbba   :  { %v655_v37 = vpop.permute.xlu0 %654 }
 0xbbb   :  { %v657_v38 = vmul.f32 %v655_v37, %v640_v30  ;;  %v398_v30 = vadd.f32 %v1504_v46, %v1550_v54 }
 0xbbd   :  { %v658_v39 = vpack.c.bf16 %v657_v38, %v657_v38 }
 0xbbf   :  { %660 = vrot.lane.b32.xlu1 %v658_v39, %s1314_s25 }
 0xc31   :  { %v661_v40 = vpop.permute.xlu1 %660 }
 0xc32   :  { %1226 = vmatmul.msk.bf16.vlgmr.msra.gmra.mxu1 %vm441_vm7, %v661_v40 }
 0xc33   :  { %1023 = vmatpush.bf16.msra.mxu1 %v1381_v13 }
 0xc37   :  { %1024 = vmatpush.bf16.msra.mxu1 %v1419_v26 }
 0xcaf   :  { %v674_v42 = vpop.f32.mrf.mxu1 }
 0xcb0   :  { %v678_v43 = vadd.f32 %v674_v42, %v393_v41 }
 0xcb2   :  { %v679_v44 = vmul.f32 0.5, %v678_v43 }
 0xcb4   :  { %v680_v45 = vsel %vm1507_vm6, %v678_v43, %v679_v44 }
 0xcb5   :  { %1267 = vtanh.f32 %v680_v45 }
 0xcb7   :  { %v676_v47 = vpop.f32.mrf.mxu1 }
 0xcbb   :  { %v1268_v48 = vpop.eup %1267 }
 0xcbc   :  { %v682_v49 = vmul.f32 0.5, %v1268_v48 }
 0xcbe   :  { %v683_v50 = vadd.f32 0.5, %v682_v49 }
 0xcc0   :  { %v684_v63 = vsel %vm1507_vm6, %v1268_v48, %v683_v50  ;;  %v401_v48 = vadd.f32 %v1504_v46, %v1552_v55 }
 0xcc1   :  { %687 = vrot.lane.b32.xlu2 %v684_v63, %s1313_s4  ;;  %v685_v51 = vmul.f32 %v684_v63, %v651_v35 }
 0xd1b   :  { %v688_v0 = vpop.permute.xlu2 %687 }
 0xd1c   :  { %v690_v1 = vmul.f32 %v688_v0, %v684_v63 }
 0xd1e   :  { %692 = vrot.lane.b32.xlu0 %v690_v1, %s1314_s25 }
 0xd90   :  { %v693_v2 = vpop.permute.xlu0 %692 }
 0xd91   :  { %v695_v3 = vadd.f32 %v693_v2, %v685_v51 }
 0xd93   :  { %1269 = vtanh.f32 %v695_v3 }
 0xd99   :  { %v1270_v4 = vpop.eup %1269 }
 0xd9a   :  { %698 = vrot.lane.b32.xlu1 %v1270_v4, %s1313_s4 }
 0xe0c   :  { %v699_v5 = vpop.permute.xlu1 %698 }
 0xe0d   :  { %v701_v6 = vmul.f32 %v699_v5, %v684_v63 }
 0xe0f   :  { %v702_v7 = vpack.c.bf16 %v701_v6, %v701_v6 }
 0xe11   :  { %704 = vrot.lane.b32.xlu2 %v702_v7, %s1314_s25 }
 0xe6b   :  { %v705_v8 = vpop.permute.xlu2 %704 }
 0xe6c   :  { %1227 = vmatmul.msk.bf16.vlgmr.msra.gmra.mxu2 %vm441_vm7, %v705_v8 }
 0xe6d   :  { %1067 = vmatpush.bf16.msra.mxu2 %v1381_v13 }
 0xe71   :  { %1068 = vmatpush.bf16.msra.mxu2 %v1419_v26 }
 0xeef   :  { %v718_v10 = vpop.f32.mrf.mxu2 }
 0xef0   :  { %v722_v11 = vadd.f32 %v718_v10, %v396_v9 }
 0xef2   :  { %v723_v12 = vmul.f32 0.5, %v722_v11 }
 0xef4   :  { %v724_v14 = vsel %vm1507_vm6, %v722_v11, %v723_v12 }
 0xef5   :  { %1271 = vtanh.f32 %v724_v14 }
 0xef7   :  { %v720_v15 = vpop.f32.mrf.mxu2 }
 0xef8   :  { %v403_v15 = vadd.f32 %v1504_v46, %v1554_v56 }
 0xefb   :  { %v1272_v16 = vpop.eup %1271 }
 0xefc   :  { %v726_v17 = vmul.f32 0.5, %v1272_v16 }
 0xefe   :  { %v727_v18 = vadd.f32 0.5, %v726_v17 }
 0xf00   :  { %v728_v19 = vsel %vm1507_vm6, %v1272_v16, %v727_v18 }
 0xf01   :  { %731 = vrot.lane.b32.xlu0 %v728_v19, %s1313_s4  ;;  %v729_v53 = vmul.f32 %v728_v19, %v695_v3 }
 0xf73   :  { %v732_v20 = vpop.permute.xlu0 %731 }
 0xf74   :  { %v734_v21 = vmul.f32 %v732_v20, %v728_v19 }
 0xf76   :  { %736 = vrot.lane.b32.xlu1 %v734_v21, %s1314_s25 }
 0xfe8   :  { %v737_v22 = vpop.permute.xlu1 %736 }
 0xfe9   :  { %v739_v23 = vadd.f32 %v737_v22, %v729_v53 }
 0xfeb   :  { %1273 = vtanh.f32 %v739_v23 }
 0xff1   :  { %v1274_v24 = vpop.eup %1273 }
 0xff2   :  { %742 = vrot.lane.b32.xlu2 %v1274_v24, %s1313_s4 }
0x104c   :  { %v743_v25 = vpop.permute.xlu2 %742 }
0x104d   :  { %v745_v27 = vmul.f32 %v743_v25, %v728_v19 }
0x104f   :  { %v746_v28 = vpack.c.bf16 %v745_v27, %v745_v27 }
0x1051   :  { %748 = vrot.lane.b32.xlu0 %v746_v28, %s1314_s25 }
0x10c3   :  { %v749_v29 = vpop.permute.xlu0 %748 }
0x10c4   :  { %1228 = vmatmul.msk.bf16.vlgmr.msra.gmra.mxu3 %vm441_vm7, %v749_v29 }
0x10c5   :  { %1111 = vmatpush.bf16.msra.mxu3 %v1381_v13 }
0x10c9   :  { %1112 = vmatpush.bf16.msra.mxu3 %v1419_v26 }
0x1147   :  { %v762_v31 = vpop.f32.mrf.mxu3 }
0x1148   :  { %v766_v32 = vadd.f32 %v762_v31, %v398_v30 }
0x114a   :  { %v767_v33 = vmul.f32 0.5, %v766_v32 }
0x114c   :  { %v768_v34 = vsel %vm1507_vm6, %v766_v32, %v767_v33 }
0x114d   :  { %1275 = vtanh.f32 %v768_v34  ;;  %v406_v34 = vadd.f32 %v1504_v46, %v1556_v57 }
0x114f   :  { %v764_v35 = vpop.f32.mrf.mxu3 }
0x1153   :  { %v1276_v36 = vpop.eup %1275 }
0x1154   :  { %v770_v37 = vmul.f32 0.5, %v1276_v36 }
0x1156   :  { %v771_v38 = vadd.f32 0.5, %v770_v37 }
0x1158   :  { %v772_v39 = vsel %vm1507_vm6, %v1276_v36, %v771_v38 }
0x1159   :  { %775 = vrot.lane.b32.xlu1 %v772_v39, %s1313_s4  ;;  %v773_v54 = vmul.f32 %v772_v39, %v739_v23 }
0x11cb   :  { %v776_v13 = vpop.permute.xlu1 %775 }
0x11cc   :  { %v778_v26 = vmul.f32 %v776_v13, %v772_v39 }
0x11ce   :  { %780 = vrot.lane.b32.xlu2 %v778_v26, %s1314_s25 }
0x1228   :  { %v781_v40 = vpop.permute.xlu2 %780 }
0x1229   :  { %v783_v41 = vadd.f32 %v781_v40, %v773_v54 }
0x122b   :  { %1277 = vtanh.f32 %v783_v41 }
0x1231   :  { %v1278_v42 = vpop.eup %1277 }
0x1232   :  { %786 = vrot.lane.b32.xlu0 %v1278_v42, %s1313_s4 }
0x12a4   :  { %v787_v43 = vpop.permute.xlu0 %786 }
0x12a5   :  { %v789_v44 = vmul.f32 %v787_v43, %v772_v39 }
0x12a7   :  { %v790_v45 = vpack.c.bf16 %v789_v44, %v789_v44 }
0x12a9   :  { %792 = vrot.lane.b32.xlu1 %v790_v45, %s1314_s25 }
0x131b   :  { %v793_v47 = vpop.permute.xlu1 %792 }
0x131c   :  { %1229 = vmatmul.msk.bf16.vlgmr.msrb.gmra.mxu0 %vm441_vm7, %v793_v47 }
0x1399   :  { %v806_v49 = vpop.f32.mrf.mxu0 }
0x139a   :  { %v810_v50 = vadd.f32 %v806_v49, %v401_v48 }
0x139c   :  { %v811_v63 = vmul.f32 0.5, %v810_v50 }
0x139e   :  { %v812_v0 = vsel %vm1507_vm6, %v810_v50, %v811_v63  ;;  %v408_v63 = vadd.f32 %v1504_v46, %v1558_v58 }
0x139f   :  { %1279 = vtanh.f32 %v812_v0 }
0x13a1   :  { %v808_v1 = vpop.f32.mrf.mxu0 }
0x13a5   :  { %v1280_v51 = vpop.eup %1279 }
0x13a6   :  { %v814_v2 = vmul.f32 0.5, %v1280_v51 }
0x13a8   :  { %v815_v3 = vadd.f32 0.5, %v814_v2 }
0x13aa   :  { %v816_v4 = vsel %vm1507_vm6, %v1280_v51, %v815_v3 }
0x13ab   :  { %819 = vrot.lane.b32.xlu2 %v816_v4, %s1313_s4  ;;  %v817_v55 = vmul.f32 %v816_v4, %v783_v41 }
0x1405   :  { %v820_v5 = vpop.permute.xlu2 %819 }
0x1406   :  { %v822_v6 = vmul.f32 %v820_v5, %v816_v4 }
0x1408   :  { %824 = vrot.lane.b32.xlu0 %v822_v6, %s1314_s25 }
0x147a   :  { %v825_v7 = vpop.permute.xlu0 %824 }
0x147b   :  { %v827_v8 = vadd.f32 %v825_v7, %v817_v55 }
0x147d   :  { %1281 = vtanh.f32 %v827_v8 }
0x1483   :  { %v1282_v9 = vpop.eup %1281 }
0x1484   :  { %830 = vrot.lane.b32.xlu1 %v1282_v9, %s1313_s4 }
0x14f6   :  { %v831_v10 = vpop.permute.xlu1 %830 }
0x14f7   :  { %v833_v11 = vmul.f32 %v831_v10, %v816_v4 }
0x14f9   :  { %v834_v12 = vpack.c.bf16 %v833_v11, %v833_v11 }
0x14fb   :  { %836 = vrot.lane.b32.xlu2 %v834_v12, %s1314_s25 }
0x1555   :  { %v837_v14 = vpop.permute.xlu2 %836 }
0x1556   :  { %1230 = vmatmul.msk.bf16.vlgmr.msrb.gmra.mxu1 %vm441_vm7, %v837_v14 }
0x15d3   :  { %v850_v16 = vpop.f32.mrf.mxu1 }
0x15d4   :  { %v854_v17 = vadd.f32 %v850_v16, %v403_v15 }
0x15d6   :  { %v855_v18 = vmul.f32 0.5, %v854_v17 }
0x15d8   :  { %v856_v19 = vsel %vm1507_vm6, %v854_v17, %v855_v18  ;;  %v411_v17 = vadd.f32 %v1504_v46, %v1560_v59 }
0x15d9   :  { %1283 = vtanh.f32 %v856_v19 }
0x15db   :  { %v852_v20 = vpop.f32.mrf.mxu1 }
0x15df   :  { %v1284_v21 = vpop.eup %1283 }
0x15e0   :  { %v858_v53 = vmul.f32 0.5, %v1284_v21 }
0x15e2   :  { %v859_v22 = vadd.f32 0.5, %v858_v53 }
0x15e4   :  { %v860_v23 = vsel %vm1507_vm6, %v1284_v21, %v859_v22 }
0x15e5   :  { %863 = vrot.lane.b32.xlu0 %v860_v23, %s1313_s4  ;;  %v861_v56 = vmul.f32 %v860_v23, %v827_v8 }
0x1657   :  { %v864_v24 = vpop.permute.xlu0 %863 }
0x1658   :  { %v866_v25 = vmul.f32 %v864_v24, %v860_v23 }
0x165a   :  { %868 = vrot.lane.b32.xlu1 %v866_v25, %s1314_s25 }
0x16cc   :  { %v869_v27 = vpop.permute.xlu1 %868 }
0x16cd   :  { %v871_v28 = vadd.f32 %v869_v27, %v861_v56 }
0x16cf   :  { %1285 = vtanh.f32 %v871_v28 }
0x16d5   :  { %v1286_v29 = vpop.eup %1285 }
0x16d6   :  { %874 = vrot.lane.b32.xlu2 %v1286_v29, %s1313_s4 }
0x1730   :  { %v875_v30 = vpop.permute.xlu2 %874 }
0x1731   :  { %v877_v31 = vmul.f32 %v875_v30, %v860_v23 }
0x1733   :  { %v878_v32 = vpack.c.bf16 %v877_v31, %v877_v31 }
0x1735   :  { %880 = vrot.lane.b32.xlu0 %v878_v32, %s1314_s25 }
0x17a7   :  { %v881_v33 = vpop.permute.xlu0 %880 }
0x17a8   :  { %1231 = vmatmul.msk.bf16.vlgmr.msrb.gmra.mxu2 %vm441_vm7, %v881_v33 }
0x182b   :  { %v894_v35 = vpop.f32.mrf.mxu2 }
0x182c   :  { %v898_v36 = vadd.f32 %v894_v35, %v406_v34  ;;  %v413_v35 = vadd.f32 %v1504_v46, %v1562_v60 }
0x182e   :  { %v899_v37 = vmul.f32 0.5, %v898_v36 }
0x1830   :  { %v900_v38 = vsel %vm1507_vm6, %v898_v36, %v899_v37 }
0x1831   :  { %1287 = vtanh.f32 %v900_v38 }
0x1833   :  { %v896_v39 = vpop.f32.mrf.mxu2 }
0x1837   :  { %v1288_v13 = vpop.eup %1287 }
0x1838   :  { %v902_v26 = vmul.f32 0.5, %v1288_v13 }
0x183a   :  { %v903_v54 = vadd.f32 0.5, %v902_v26 }
0x183c   :  { %v904_v40 = vsel %vm1507_vm6, %v1288_v13, %v903_v54 }
0x183d   :  { %907 = vrot.lane.b32.xlu1 %v904_v40, %s1313_s4  ;;  %v905_v57 = vmul.f32 %v904_v40, %v871_v28 }
0x18af   :  { %v908_v41 = vpop.permute.xlu1 %907 }
0x18b0   :  { %v910_v42 = vmul.f32 %v908_v41, %v904_v40 }
0x18b2   :  { %912 = vrot.lane.b32.xlu2 %v910_v42, %s1314_s25 }
0x190c   :  { %v913_v43 = vpop.permute.xlu2 %912 }
0x190d   :  { %v915_v44 = vadd.f32 %v913_v43, %v905_v57 }
0x190f   :  { %1289 = vtanh.f32 %v915_v44 }
0x1915   :  { %v1290_v45 = vpop.eup %1289 }
0x1916   :  { %918 = vrot.lane.b32.xlu0 %v1290_v45, %s1313_s4 }
0x1988   :  { %v919_v47 = vpop.permute.xlu0 %918 }
0x1989   :  { %v921_v48 = vmul.f32 %v919_v47, %v904_v40 }
0x198b   :  { %v922_v49 = vpack.c.bf16 %v921_v48, %v921_v48 }
0x198d   :  { %924 = vrot.lane.b32.xlu1 %v922_v49, %s1314_s25 }
0x19ff   :  { %v925_v50 = vpop.permute.xlu1 %924 }
0x1a00   :  { %1232 = vmatmul.msk.bf16.vlgmr.msrb.gmra.mxu3 %vm441_vm7, %v925_v50 }
0x1a83   :  { %v938_v0 = vpop.f32.mrf.mxu3 }
0x1a84   :  { %v942_v1 = vadd.f32 %v938_v0, %v408_v63  ;;  %v416_v63 = vadd.f32 %v1504_v46, %v1564_v61 }
0x1a86   :  { %v943_v51 = vmul.f32 0.5, %v942_v1 }
0x1a88   :  { %v944_v2 = vsel %vm1507_vm6, %v942_v1, %v943_v51 }
0x1a89   :  { %1291 = vtanh.f32 %v944_v2 }
0x1a8b   :  { %v940_v3 = vpop.f32.mrf.mxu3 }
0x1a8f   :  { %v1292_v4 = vpop.eup %1291 }
0x1a90   :  { %v946_v5 = vmul.f32 0.5, %v1292_v4 }
0x1a92   :  { %v947_v6 = vadd.f32 0.5, %v946_v5 }
0x1a94   :  { %v948_v55 = vsel %vm1507_vm6, %v1292_v4, %v947_v6 }
0x1a95   :  { %951 = vrot.lane.b32.xlu2 %v948_v55, %s1313_s4  ;;  %v949_v58 = vmul.f32 %v948_v55, %v915_v44 }
0x1aef   :  { %v952_v7 = vpop.permute.xlu2 %951 }
0x1af0   :  { %v954_v8 = vmul.f32 %v952_v7, %v948_v55 }
0x1af2   :  { %956 = vrot.lane.b32.xlu0 %v954_v8, %s1314_s25 }
0x1b64   :  { %v957_v9 = vpop.permute.xlu0 %956 }
0x1b65   :  { %v959_v10 = vadd.f32 %v957_v9, %v949_v58 }
0x1b67   :  { %1293 = vtanh.f32 %v959_v10 }
0x1b6d   :  { %v1294_v11 = vpop.eup %1293 }
0x1b6e   :  { %962 = vrot.lane.b32.xlu1 %v1294_v11, %s1313_s4 }
0x1be0   :  { %v963_v12 = vpop.permute.xlu1 %962 }
0x1be1   :  { %v965_v14 = vmul.f32 %v963_v12, %v948_v55 }
0x1be3   :  { %v966_v15 = vpack.c.bf16 %v965_v14, %v965_v14 }
0x1be5   :  { %968 = vrot.lane.b32.xlu2 %v966_v15, %s1314_s25 }
0x1c3f   :  { %v969_v16 = vpop.permute.xlu2 %968 }
0x1c40   :  { %1233 = vmatmul.msk.bf16.vlgmr.msra.gmra.mxu0 %vm441_vm7, %v969_v16  ;;  %v418_v16 = vadd.f32 %v1504_v46, %v1566_v62 }
0x1cbd   :  { %v982_v18 = vpop.f32.mrf.mxu0 }
0x1cbe   :  { %v986_v19 = vadd.f32 %v982_v18, %v411_v17 }
0x1cc0   :  { %v987_v20 = vmul.f32 0.5, %v986_v19 }
0x1cc2   :  { %v988_v21 = vsel %vm1507_vm6, %v986_v19, %v987_v20 }
0x1cc3   :  { %1295 = vtanh.f32 %v988_v21 }
0x1cc5   :  { %v984_v53 = vpop.f32.mrf.mxu0 }
0x1cc9   :  { %v1296_v22 = vpop.eup %1295 }
0x1cca   :  { %v990_v23 = vmul.f32 0.5, %v1296_v22 }
0x1ccc   :  { %v991_v24 = vadd.f32 0.5, %v990_v23 }
0x1cce   :  { %v992_v25 = vsel %vm1507_vm6, %v1296_v22, %v991_v24 }
0x1ccf   :  { %995 = vrot.lane.b32.xlu0 %v992_v25, %s1313_s4  ;;  %v993_v59 = vmul.f32 %v992_v25, %v959_v10 }
0x1d41   :  { %v996_v56 = vpop.permute.xlu0 %995 }
0x1d42   :  { %v998_v27 = vmul.f32 %v996_v56, %v992_v25 }
0x1d44   :  { %1000 = vrot.lane.b32.xlu1 %v998_v27, %s1314_s25 }
0x1db6   :  { %v1001_v28 = vpop.permute.xlu1 %1000 }
0x1db7   :  { %v1003_v29 = vadd.f32 %v1001_v28, %v993_v59  ;;  %v1145_v28 = vld [vmem:[%s1742_s6 + $0x18] sm:$0xff] }
0x1db8   :  { %1167 = vmatpush.msrb.mxu0 %v1145_v28 }
0x1db9   :  { %1297 = vtanh.f32 %v1003_v29 }
0x1dba   :  { %1168 = vmatpush.msrb.mxu0 %v1144_v52 }
0x1dbf   :  { %v1298_v30 = vpop.eup %1297 }
0x1dc0   :  { %1006 = vrot.lane.b32.xlu2 %v1298_v30, %s1313_s4  ;;  %v1142_v30 = vld [vmem:[%s1742_s6] sm:$0xff] }
0x1e1a   :  { %v1007_v31 = vpop.permute.xlu2 %1006 }
0x1e1b   :  { %v1009_v32 = vmul.f32 %v1007_v31, %v992_v25 }
0x1e1d   :  { %v1010_v33 = vpack.c.bf16 %v1009_v32, %v1009_v32 }
0x1e1f   :  { %1012 = vrot.lane.b32.xlu0 %v1010_v33, %s1314_s25 }
0x1e91   :  { %v1013_v34 = vpop.permute.xlu0 %1012 }
0x1e92   :  { %1234 = vmatmul.msk.bf16.vlgmr.msra.gmra.mxu1 %vm441_vm7, %v1013_v34  ;;  %v1246_v34 = vld [vmem:[%s1743_s7] ss:$0 sm:$0xff] }
0x1f0f   :  { %v1026_v36 = vpop.f32.mrf.mxu1 }
0x1f10   :  { %v1030_v37 = vadd.f32 %v1026_v36, %v413_v35 }
0x1f12   :  { %v1031_v38 = vmul.f32 0.5, %v1030_v37 }
0x1f14   :  { %v1032_v39 = vsel %vm1507_vm6, %v1030_v37, %v1031_v38 }
0x1f15   :  { %1299 = vtanh.f32 %v1032_v39 }
0x1f17   :  { %v1028_v13 = vpop.f32.mrf.mxu1 }
0x1f1b   :  { %v1300_v26 = vpop.eup %1299 }
0x1f1c   :  { %v1034_v54 = vmul.f32 0.5, %v1300_v26 }
0x1f1e   :  { %v1035_v40 = vadd.f32 0.5, %v1034_v54 }
0x1f20   :  { %v1036_v41 = vsel %vm1507_vm6, %v1300_v26, %v1035_v40 }
0x1f21   :  { %1039 = vrot.lane.b32.xlu1 %v1036_v41, %s1313_s4  ;;  %v1037_v60 = vmul.f32 %v1036_v41, %v1003_v29  ;;  %v1143_v29 = vld [vmem:[%s1742_s6 + $0x8] sm:$0xff] }
0x1f22   :  { %1169 = vmatpush.msrb.mxu0 %v1143_v29 }
0x1f24   :  { %1170 = vmatpush.msrb.mxu0 %v1142_v30 }
0x1f93   :  { %v1040_v42 = vpop.permute.xlu1 %1039 }
0x1f94   :  { %v1042_v57 = vmul.f32 %v1040_v42, %v1036_v41 }
0x1f96   :  { %1044 = vrot.lane.b32.xlu2 %v1042_v57, %s1314_s25 }
0x1ff0   :  { %v1045_v43 = vpop.permute.xlu2 %1044 }
0x1ff1   :  { %v1047_v44 = vadd.f32 %v1045_v43, %v1037_v60 }
0x1ff3   :  { %1301 = vtanh.f32 %v1047_v44 }
0x1ff9   :  { %v1302_v45 = vpop.eup %1301 }
0x1ffa   :  { %1050 = vrot.lane.b32.xlu0 %v1302_v45, %s1313_s4 }
0x206c   :  { %v1051_v47 = vpop.permute.xlu0 %1050 }
0x206d   :  { %v1053_v48 = vmul.f32 %v1051_v47, %v1036_v41 }
0x206f   :  { %v1054_v49 = vpack.c.bf16 %v1053_v48, %v1053_v48 }
0x2071   :  { %1056 = vrot.lane.b32.xlu1 %v1054_v49, %s1314_s25 }
0x20e3   :  { %v1057_v50 = vpop.permute.xlu1 %1056 }
0x20e4   :  { %1235 = vmatmul.msk.bf16.vlgmr.msra.gmra.mxu2 %vm441_vm7, %v1057_v50 }
0x2167   :  { %v1070_v0 = vpop.f32.mrf.mxu2 }
0x2168   :  { %v1074_v1 = vadd.f32 %v1070_v0, %v416_v63 }
0x216a   :  { %v1075_v51 = vmul.f32 0.5, %v1074_v1 }
0x216c   :  { %v1076_v2 = vsel %vm1507_vm6, %v1074_v1, %v1075_v51 }
0x216d   :  { %1303 = vtanh.f32 %v1076_v2 }
0x216f   :  { %v1072_v3 = vpop.f32.mrf.mxu2 }
0x2173   :  { %v1304_v4 = vpop.eup %1303 }
0x2174   :  { %v1078_v5 = vmul.f32 0.5, %v1304_v4 }
0x2176   :  { %v1079_v6 = vadd.f32 0.5, %v1078_v5 }
0x2178   :  { %v1080_v55 = vsel %vm1507_vm6, %v1304_v4, %v1079_v6 }
0x2179   :  { %1083 = vrot.lane.b32.xlu2 %v1080_v55, %s1313_s4  ;;  %v1081_v61 = vmul.f32 %v1080_v55, %v1047_v44 }
0x21d3   :  { %v1084_v7 = vpop.permute.xlu2 %1083 }
0x21d4   :  { %v1086_v8 = vmul.f32 %v1084_v7, %v1080_v55 }
0x21d6   :  { %1088 = vrot.lane.b32.xlu0 %v1086_v8, %s1314_s25 }
0x2248   :  { %v1089_v58 = vpop.permute.xlu0 %1088 }
0x2249   :  { %v1091_v9 = vadd.f32 %v1089_v58, %v1081_v61 }
0x224b   :  { %1305 = vtanh.f32 %v1091_v9 }
0x2251   :  { %v1306_v10 = vpop.eup %1305 }
0x2252   :  { %1094 = vrot.lane.b32.xlu1 %v1306_v10, %s1313_s4 }
0x22c4   :  { %v1095_v11 = vpop.permute.xlu1 %1094 }
0x22c5   :  { %v1097_v12 = vmul.f32 %v1095_v11, %v1080_v55 }
0x22c7   :  { %v1098_v14 = vpack.c.bf16 %v1097_v12, %v1097_v12 }
0x22c9   :  { %1100 = vrot.lane.b32.xlu2 %v1098_v14, %s1314_s25 }
0x2323   :  { %v1101_v15 = vpop.permute.xlu2 %1100 }
0x2324   :  { %1236 = vmatmul.msk.bf16.vlgmr.msra.gmra.mxu3 %vm441_vm7, %v1101_v15 }
0x23a7   :  { %v1114_v17 = vpop.f32.mrf.mxu3 }
0x23a8   :  { %v1118_v18 = vadd.f32 %v1114_v17, %v418_v16 }
0x23aa   :  { %v1119_v19 = vmul.f32 0.5, %v1118_v18 }
0x23ac   :  { %v1120_v20 = vsel %vm1507_vm6, %v1118_v18, %v1119_v19 }
0x23ad   :  { %1307 = vtanh.f32 %v1120_v20 }
0x23af   :  { %v1116_v21 = vpop.f32.mrf.mxu3 }
0x23b3   :  { %v1308_v53 = vpop.eup %1307 }
0x23b4   :  { %v1122_v22 = vmul.f32 0.5, %v1308_v53 }
0x23b6   :  { %v1123_v23 = vadd.f32 0.5, %v1122_v22 }
0x23b8   :  { %v1124_v24 = vsel %vm1507_vm6, %v1308_v53, %v1123_v23 }
0x23b9   :  { %1127 = vrot.lane.b32.xlu0 %v1124_v24, %s1313_s4  ;;  %v1125_v46 = vmul.f32 %v1124_v24, %v1091_v9 }
0x242b   :  { %v1128_v25 = vpop.permute.xlu0 %1127 }
0x242c   :  { %v1130_v56 = vmul.f32 %v1128_v25, %v1124_v24 }
0x242e   :  { %1132 = vrot.lane.b32.xlu1 %v1130_v56, %s1314_s25 }
0x24a0   :  { %v1133_v62 = vpop.permute.xlu1 %1132 }
0x24a1   :  { %v1135_v27 = vadd.f32 %v1133_v62, %v1125_v46 }
0x24a3   :  { %1309 = vtanh.f32 %v1135_v27 }
0x24a9   :  { %v1310_v59 = vpop.eup %1309 }
0x24aa   :  { %1138 = vrot.lane.b32.xlu2 %v1310_v59, %s1313_s4 }
0x2504   :  { %v1139_v31 = vpop.permute.xlu2 %1138 }
0x2505   :  { %v1141_v32 = vmul.f32 %v1139_v31, %v1124_v24 }
0x2507   :  { %1151 = vrot.lane.b32.xlu0 %v1141_v32, %s1314_s25 }
0x2579   :  { %v1152_v33 = vpop.permute.xlu0 %1151 }
0x257a   :  { %1237 = vmatmul.msk.f32.vlgmr.msrb.gmra.mxu0 %vm441_vm7, %v1152_v33 }
0x25f7   :  { %v1172_v35 = vpop.f32.mrf.mxu0 }
0x25f8   :  { %v1173_v36 = vadd.f32 %v1246_v34, %v1172_v35 }
0x25fa   :  { %1175 = vst.msk [vmem:[%s1744_s8] sm:$0xff] %vm65_vm1, %v1173_v36 }

</bundles_post_ra>
